<compile_context>
chip_gen: v7x
topology: tpu7x:2x2x1
jax: 0.10.0
libtpu: 0.0.40
codegen_flags: <defaults>
</compile_context>

<pallas_src>
import functools

import jax
import jax.numpy as jnp
import numpy as np
from jax.experimental import pallas as pl
from jax.experimental.pallas import tpu as pltpu

EMBED = 128
HEADS = 8
HEAD_DIM = EMBED // HEADS
N_LAYERS = 2
EPS = 1e-5  # nn.LayerNorm default

_TARGET_ROWS = 256                 # fill MXU M dim on v6e/v7x (>=128 already fills v5e)
_VMEM_BUDGET = 32 * 1024 * 1024    # conservative per-block budget (v7x: 64 MiB physical)
_VMEM_LIMIT = 48 * 1024 * 1024     # explicit scoped-VMEM limit handed to Mosaic


# ----------------------------- kernel helpers -----------------------------

def _layer_norm(h, gamma, beta):
    # Single-pass statistics: mean and mean-of-squares as independent reductions,
    # var = E[x^2] - mu^2 (one fewer elementwise pass, shorter XLU chain).
    mu = jnp.mean(h, axis=-1, keepdims=True)
    ms = jnp.mean(h * h, axis=-1, keepdims=True)
    var = ms - mu * mu
    return (h - mu) * jax.lax.rsqrt(var + EPS) * gamma + beta


def _transformer_layer(h, bt, n,
                       wqkv_ref, bqkv_ref, wc_ref, bc_ref,
                       g1_ref, be1_ref, g2_ref, be2_ref):
    """One 'transformer' attention layer on a (bt*n, D) f32 activation block."""
    m = bt * n
    bf16 = jnp.bfloat16

    # Fused QKV projection: (bt*n,128)x(128,384) bf16 matmul, f32 accumulation.
    qkv = jnp.dot(h.astype(bf16), wqkv_ref[...],
                  preferred_element_type=jnp.float32) + bqkv_ref[0]       # (m, 3D)

    # Head split, batched over the whole block (no per-batch loop, no concat).
    # Only last-two-dim swaps + tile-preserving reshapes (sublane splits at
    # multiples of 8, 128-aligned sublane slices).
    qkv_t = jnp.swapaxes(qkv.reshape(bt, n, 3 * EMBED), -1, -2)            # (bt, 3D, n)

    def heads_t(i):
        part = qkv_t[:, i * EMBED:(i + 1) * EMBED, :]                      # (bt, D, n)
        return part.reshape(bt * HEADS, HEAD_DIM, n)                       # [b,h,d,n]

    q_t, k_t, v_t = heads_t(0), heads_t(1), heads_t(2)                     # (bt*H, Dh, n)
    qh = jnp.swapaxes(q_t, -1, -2)                                         # (bt*H, n, Dh)

    # Scores: (bt*H)-batched matmul; 1/sqrt(Dh) already folded into Wq/bq.
    s = jnp.einsum("bnd,bdm->bnm", qh.astype(bf16), k_t.astype(bf16),
                   preferred_element_type=jnp.float32)                     # (bt*H, n, n)
    s = s - jnp.max(s, axis=-1, keepdims=True)
    p = jnp.exp(s)
    p = p * pl.reciprocal(jnp.sum(p, axis=-1, keepdims=True), approx=True)

    # P·V produced directly in transposed [b,h,d,n] layout -> head recombination
    # needs a single minor transpose.
    o_t = jnp.einsum("bdm,bnm->bdn", v_t.astype(bf16), p.astype(bf16),
                     preferred_element_type=jnp.float32)                   # (bt*H, Dh, n)
    o = jnp.swapaxes(o_t.reshape(bt, EMBED, n), -1, -2).reshape(m, EMBED)  # (m, D)

    mha = jnp.dot(o.astype(bf16), wc_ref[...],
                  preferred_element_type=jnp.float32) + bc_ref[0]          # (m, D)

    res = _layer_norm(mha + h, g1_ref[0], be1_ref[0])
    # "mlp" is just ReLU (original-module quirk), then residual + LayerNorm2.
    return _layer_norm(jnp.maximum(res, 0.0) + res, g2_ref[0], be2_ref[0])


def _self_attention_kernel(n_layers, x_ref, *refs):
    o_ref = refs[-1]
    w = refs[:-1]                       # 8 refs per layer
    bt, n, d = x_ref.shape
    h = x_ref[...].reshape(bt * n, d)   # f32 activations, resident in VMEM
    for layer in range(n_layers):
        h = _transformer_layer(h, bt, n, *w[8 * layer: 8 * layer + 8])
    o_ref[...] = h.reshape(bt, n, d)


# ----------------------------- host-side wrapper -----------------------------

def _pack_params(p):
    """Fold scale into q, fuse QKV, pre-transpose to (in, out), cast W to bf16."""
    scale = np.float32(1.0 / np.sqrt(HEAD_DIM))
    wq = p["wq"] * scale                                        # (D, D) out,in
    bq = p["bq"] * scale                                        # (1, D)
    wqkv = jnp.concatenate([wq, p["wk"], p["wv"]], axis=0).T    # (D, 3D) in,out
    bqkv = jnp.concatenate([bq, p["bk"], p["bv"]], axis=1)      # (1, 3D)
    return (wqkv.astype(jnp.bfloat16),
            bqkv.astype(jnp.float32),
            p["wc"].T.astype(jnp.bfloat16),                     # (D, D) in,out
            p["bc"].astype(jnp.float32),
            p["g1"], p["be1"], p["g2"], p["be2"])


def _vmem_block_bytes(bt, n):
    """Rough per-grid-step VMEM footprint (bytes) used to bound the block size."""
    m = bt * n
    f32 = 4
    io = 2 * 2 * m * EMBED * f32                  # double-buffered input + output blocks
    act = 3 * m * EMBED * f32                     # h, res, mha
    qkv = 2 * m * 3 * EMBED * f32                 # qkv + transposed copy
    heads = 2 * m * EMBED * f32                   # qh + recombined o
    scores = 2 * bt * HEADS * n * n * f32         # s and p
    params = 2 * N_LAYERS * (4 * EMBED * EMBED * 2 + 6 * EMBED * f32)
    slack = 2 << 20
    return io + act + qkv + heads + scores + params + slack


def _pick_block_b(batch, seqlen):
    """Batch-block size: fill the MXU M dim (bt*N >= 256) with the deepest grid
    that still does so, stay under the VMEM budget, and keep >= 2 grid steps
    (megacore / pipelining) whenever the batch allows."""
    divs = [d for d in range(1, batch + 1)
            if batch % d == 0 and _vmem_block_bytes(d, seqlen) <= _VMEM_BUDGET]
    if not divs:
        return 1
    cands = [d for d in divs if batch // d >= 2] or divs
    reach = [d for d in cands if d * seqlen >= _TARGET_ROWS]
    if reach:
        return min(reach)      # smallest block that fills the MXU -> deepest pipeline
    return max(cands)          # otherwise maximize matmul rows per step


@jax.jit
def self_attention(x, layer_params):
    """SelfAttention.forward: all layers fused into a single pallas_call."""
    B, N, D = x.shape
    assert D == EMBED
    bt = _pick_block_b(B, N)
    n_layers = len(layer_params)

    packed = []
    for p in layer_params:
        packed.extend(_pack_params(p))

    x_spec = pl.BlockSpec((bt, N, D), lambda b: (b, 0, 0))
    in_specs = [x_spec]
    for arr in packed:    # all params are 2D and loop-invariant (constant index_map,
        # so the pipeline keeps them resident and never re-issues their DMA)
        in_specs.append(pl.BlockSpec(arr.shape, lambda b: (0, 0)))

    return pl.pallas_call(
        functools.partial(_self_attention_kernel, n_layers),
        out_shape=jax.ShapeDtypeStruct((B, N, D), jnp.float32),
        grid_spec=pltpu.PrefetchScalarGridSpec(
            num_scalar_prefetch=0,
            grid=(B // bt,),
            in_specs=in_specs,
            out_specs=pl.BlockSpec((bt, N, D), lambda b: (b, 0, 0)),
        ),
        compiler_params=pltpu.CompilerParams(
            dimension_semantics=("parallel",),
            vmem_limit_bytes=_VMEM_LIMIT),
    )(x, *packed)


# ---------------- deterministic parameter init (PyTorch layout) ----------------

def init_layer_params(key):
    ks = jax.random.split(key, 8)
    bound = 1.0 / np.sqrt(EMBED)  # nn.Linear default init range

    def lin(kw, kb):
        w = jax.random.uniform(kw, (EMBED, EMBED), jnp.float32, -bound, bound)
        b = jax.random.uniform(kb, (1, EMBED), jnp.float32, -bound, bound)
        return w, b

    wq, bq = lin(ks[0], ks[1])
    wk, bk = lin(ks[2], ks[3])
    wv, bv = lin(ks[4], ks[5])
    wc, bc = lin(ks[6], ks[7])
    return dict(wq=wq, bq=bq, wk=wk, bk=bk, wv=wv, bv=bv, wc=wc, bc=bc,
                g1=jnp.ones((1, EMBED), jnp.float32),
                be1=jnp.zeros((1, EMBED), jnp.float32),
                g2=jnp.ones((1, EMBED), jnp.float32),
                be2=jnp.zeros((1, EMBED), jnp.float32))


# ---------------- pure-JAX f32 reference (for verification) ----------------

def _layer_ref(x, p):
    B, N, D = x.shape
    q = x @ p["wq"].T + p["bq"][0]
    k = x @ p["wk"].T + p["bk"][0]
    v = x @ p["wv"].T + p["bv"][0]

    def heads(t):
        return t.reshape(B, N, HEADS, HEAD_DIM).transpose(0, 2, 1, 3)

    qh, kh, vh = heads(q), heads(k), heads(v)
    s = jnp.einsum("bhid,bhjd->bhij", qh, kh) / np.sqrt(HEAD_DIM)
    w = jax.nn.softmax(s, axis=-1)
    o = jnp.einsum("bhij,bhjd->bhid", w, vh)
    o = o.transpose(0, 2, 1, 3).reshape(B, N, D)
    mha = o @ p["wc"].T + p["bc"][0]

    def ln(t, g, b):
        mu = jnp.mean(t, axis=-1, keepdims=True)
        var = jnp.mean((t - mu) ** 2, axis=-1, keepdims=True)
        return (t - mu) * jax.lax.rsqrt(var + EPS) * g[0] + b[0]

    res = ln(mha + x, p["g1"], p["be1"])
    return ln(jnp.maximum(res, 0.0) + res, p["g2"], p["be2"])


def self_attention_ref(x, layer_params):
    for p in layer_params:
        x = _layer_ref(x, p)
    return x


if __name__ == "__main__":
    key = jax.random.PRNGKey(0)
    k_x, k_p0, k_p1 = jax.random.split(key, 3)

    B, N, D = 2, 8, EMBED  # small: batch=2, seq=8, embed=128 (module default)
    x = jax.random.normal(k_x, (B, N, D), jnp.float32)

    layer_params = [init_layer_params(k_p0), init_layer_params(k_p1)]

    out = jax.block_until_ready(self_attention(x, layer_params))
    ref = jax.block_until_ready(self_attention_ref(x, layer_params))

    # Kernel uses bf16 matmul operands with f32 accumulation, so compare against
    # the f32 reference with a correspondingly loosened tolerance.
    np.testing.assert_allclose(np.asarray(out), np.asarray(ref),
                               atol=5e-2, rtol=5e-2)

    print("KERNEL_OK")
</pallas_src>

<mosaic_0001>
module attributes {stable_mosaic.version = 11 : i64} {
  func.func @_self_attention_kernel(%arg0: i32, %arg1: memref<1x8x128xf32, #tpu.memory_space<vmem>>, %arg2: memref<128x384xbf16, #tpu.memory_space<vmem>>, %arg3: memref<1x384xf32, #tpu.memory_space<vmem>>, %arg4: memref<128x128xbf16, #tpu.memory_space<vmem>>, %arg5: memref<1x128xf32, #tpu.memory_space<vmem>>, %arg6: memref<1x128xf32, #tpu.memory_space<vmem>>, %arg7: memref<1x128xf32, #tpu.memory_space<vmem>>, %arg8: memref<1x128xf32, #tpu.memory_space<vmem>>, %arg9: memref<1x128xf32, #tpu.memory_space<vmem>>, %arg10: memref<128x384xbf16, #tpu.memory_space<vmem>>, %arg11: memref<1x384xf32, #tpu.memory_space<vmem>>, %arg12: memref<128x128xbf16, #tpu.memory_space<vmem>>, %arg13: memref<1x128xf32, #tpu.memory_space<vmem>>, %arg14: memref<1x128xf32, #tpu.memory_space<vmem>>, %arg15: memref<1x128xf32, #tpu.memory_space<vmem>>, %arg16: memref<1x128xf32, #tpu.memory_space<vmem>>, %arg17: memref<1x128xf32, #tpu.memory_space<vmem>>, %arg18: memref<1x8x128xf32, #tpu.memory_space<vmem>>) attributes {dimension_semantics = [#tpu.dimension_semantics<parallel>], iteration_bounds = array<i64: 2>, scalar_prefetch = 0 : i64, scratch_operands = 0 : i64, tpu.core_type = #tpu.core_type<tc>, window_params = [{transform_indices = @transform_0, window_bounds = array<i64: 1, 8, 128>}, {pipeline_mode = #tpu.pipeline_mode<synchronous>, transform_indices = @transform_1, window_bounds = array<i64: 128, 384>}, {pipeline_mode = #tpu.pipeline_mode<synchronous>, transform_indices = @transform_2, window_bounds = array<i64: 1, 384>}, {pipeline_mode = #tpu.pipeline_mode<synchronous>, transform_indices = @transform_3, window_bounds = array<i64: 128, 128>}, {pipeline_mode = #tpu.pipeline_mode<synchronous>, transform_indices = @transform_4, window_bounds = array<i64: 1, 128>}, {pipeline_mode = #tpu.pipeline_mode<synchronous>, transform_indices = @transform_5, window_bounds = array<i64: 1, 128>}, {pipeline_mode = #tpu.pipeline_mode<synchronous>, transform_indices = @transform_6, window_bounds = array<i64: 1, 128>}, {pipeline_mode = #tpu.pipeline_mode<synchronous>, transform_indices = @transform_7, window_bounds = array<i64: 1, 128>}, {pipeline_mode = #tpu.pipeline_mode<synchronous>, transform_indices = @transform_8, window_bounds = array<i64: 1, 128>}, {pipeline_mode = #tpu.pipeline_mode<synchronous>, transform_indices = @transform_9, window_bounds = array<i64: 128, 384>}, {pipeline_mode = #tpu.pipeline_mode<synchronous>, transform_indices = @transform_10, window_bounds = array<i64: 1, 384>}, {pipeline_mode = #tpu.pipeline_mode<synchronous>, transform_indices = @transform_11, window_bounds = array<i64: 128, 128>}, {pipeline_mode = #tpu.pipeline_mode<synchronous>, transform_indices = @transform_12, window_bounds = array<i64: 1, 128>}, {pipeline_mode = #tpu.pipeline_mode<synchronous>, transform_indices = @transform_13, window_bounds = array<i64: 1, 128>}, {pipeline_mode = #tpu.pipeline_mode<synchronous>, transform_indices = @transform_14, window_bounds = array<i64: 1, 128>}, {pipeline_mode = #tpu.pipeline_mode<synchronous>, transform_indices = @transform_15, window_bounds = array<i64: 1, 128>}, {pipeline_mode = #tpu.pipeline_mode<synchronous>, transform_indices = @transform_16, window_bounds = array<i64: 1, 128>}, {transform_indices = @transform_17, window_bounds = array<i64: 1, 8, 128>}]} {
    %c0 = arith.constant 0 : index
    %c0_0 = arith.constant 0 : index
    %c0_1 = arith.constant 0 : index
    %0 = vector.load %arg1[%c0, %c0_0, %c0_1] : memref<1x8x128xf32, #tpu.memory_space<vmem>>, vector<1x8x128xf32>
    %1 = vector.shape_cast %0 : vector<1x8x128xf32> to vector<8x128xf32>
    %2 = arith.truncf %1 : vector<8x128xf32> to vector<8x128xbf16>
    %c0_2 = arith.constant 0 : index
    %c0_3 = arith.constant 0 : index
    %3 = vector.load %arg2[%c0_2, %c0_3] : memref<128x384xbf16, #tpu.memory_space<vmem>>, vector<128x384xbf16>
    %cst = arith.constant dense<0.000000e+00> : vector<8x384xf32>
    %4 = tpu.matmul %2, %3, %cst {dimension_numbers = #tpu.dot_dimension_numbers<[1], [0], [0], [1], [0, 0, 1, 1], [], []>} : vector<8x128xbf16>, vector<128x384xbf16>, vector<8x384xf32> -> vector<8x384xf32>
    %c0_4 = arith.constant 0 : index
    %c0_5 = arith.constant 0 : index
    %5 = vector.load %arg3[%c0_4, %c0_5] : memref<1x384xf32, #tpu.memory_space<vmem>>, vector<1x384xf32>
    %6 = vector.shape_cast %5 : vector<1x384xf32> to vector<384xf32>
    %7 = vector.shape_cast %6 : vector<384xf32> to vector<1x384xf32>
    %8 = vector.broadcast %7 : vector<1x384xf32> to vector<8x384xf32>
    %9 = arith.addf %4, %8 : vector<8x384xf32>
    %10 = vector.shape_cast %9 : vector<8x384xf32> to vector<1x8x384xf32>
    %11 = tpu.transpose %10, [0, 2, 1] : vector<1x8x384xf32> -> vector<1x384x8xf32>
    %12 = vector.extract_strided_slice %11 {offsets = [0, 0, 0], sizes = [1, 128, 8], strides = [1, 1, 1]} : vector<1x384x8xf32> to vector<1x128x8xf32>
    %13 = vector.shape_cast %12 : vector<1x128x8xf32> to vector<8x16x8xf32>
    %14 = vector.extract_strided_slice %11 {offsets = [0, 128, 0], sizes = [1, 128, 8], strides = [1, 1, 1]} : vector<1x384x8xf32> to vector<1x128x8xf32>
    %15 = vector.shape_cast %14 : vector<1x128x8xf32> to vector<8x16x8xf32>
    %16 = vector.extract_strided_slice %11 {offsets = [0, 256, 0], sizes = [1, 128, 8], strides = [1, 1, 1]} : vector<1x384x8xf32> to vector<1x128x8xf32>
    %17 = vector.shape_cast %16 : vector<1x128x8xf32> to vector<8x16x8xf32>
    %18 = tpu.transpose %13, [0, 2, 1] : vector<8x16x8xf32> -> vector<8x8x16xf32>
    %19 = arith.truncf %18 : vector<8x8x16xf32> to vector<8x8x16xbf16>
    %20 = arith.truncf %15 : vector<8x16x8xf32> to vector<8x16x8xbf16>
    "tpu.trace_start"() <{level = 10 : i32, message = "bnd,bdm->bnm"}> : () -> ()
    %cst_6 = arith.constant dense<0.000000e+00> : vector<8x8x8xf32>
    %21 = tpu.matmul %19, %20, %cst_6 {dimension_numbers = #tpu.dot_dimension_numbers<[2], [1], [1], [2], [0, 0, 0, 1, 1, 2], [0], [0]>} : vector<8x8x16xbf16>, vector<8x16x8xbf16>, vector<8x8x8xf32> -> vector<8x8x8xf32>
    "tpu.trace_stop"() : () -> ()
    %cst_7 = arith.constant dense<0xFF800000> : vector<8x8xf32>
    %22 = vector.multi_reduction <maximumf>, %21, %cst_7 [2] : vector<8x8x8xf32> to vector<8x8xf32>
    %23 = vector.shape_cast %22 : vector<8x8xf32> to vector<8x8x1xf32>
    %24 = vector.broadcast %23 : vector<8x8x1xf32> to vector<8x8x8xf32>
    %25 = arith.subf %21, %24 : vector<8x8x8xf32>
    %26 = math.exp %25 : vector<8x8x8xf32>
    %cst_8 = arith.constant dense<0.000000e+00> : vector<8x8xf32>
    %27 = vector.multi_reduction <add>, %26, %cst_8 [2] : vector<8x8x8xf32> to vector<8x8xf32>
    %28 = vector.shape_cast %27 : vector<8x8xf32> to vector<8x8x1xf32>
    %29 = tpu.reciprocal %28 {approx = true} : vector<8x8x1xf32> -> vector<8x8x1xf32>
    %30 = vector.broadcast %29 : vector<8x8x1xf32> to vector<8x8x8xf32>
    %31 = arith.mulf %26, %30 : vector<8x8x8xf32>
    %32 = arith.truncf %17 : vector<8x16x8xf32> to vector<8x16x8xbf16>
    %33 = arith.truncf %31 : vector<8x8x8xf32> to vector<8x8x8xbf16>
    "tpu.trace_start"() <{level = 10 : i32, message = "bdm,bnm->bdn"}> : () -> ()
    %cst_9 = arith.constant dense<0.000000e+00> : vector<8x16x8xf32>
    %34 = tpu.matmul %32, %33, %cst_9 {dimension_numbers = #tpu.dot_dimension_numbers<[2], [2], [1], [1], [0, 0, 0, 1, 1, 1], [0], [0]>} : vector<8x16x8xbf16>, vector<8x8x8xbf16>, vector<8x16x8xf32> -> vector<8x16x8xf32>
    "tpu.trace_stop"() : () -> ()
    %35 = vector.shape_cast %34 : vector<8x16x8xf32> to vector<1x128x8xf32>
    %36 = tpu.transpose %35, [0, 2, 1] : vector<1x128x8xf32> -> vector<1x8x128xf32>
    %37 = vector.shape_cast %36 : vector<1x8x128xf32> to vector<8x128xf32>
    %38 = arith.truncf %37 : vector<8x128xf32> to vector<8x128xbf16>
    %c0_10 = arith.constant 0 : index
    %c0_11 = arith.constant 0 : index
    %39 = vector.load %arg4[%c0_10, %c0_11] : memref<128x128xbf16, #tpu.memory_space<vmem>>, vector<128x128xbf16>
    %cst_12 = arith.constant dense<0.000000e+00> : vector<8x128xf32>
    %40 = tpu.matmul %38, %39, %cst_12 {dimension_numbers = #tpu.dot_dimension_numbers<[1], [0], [0], [1], [0, 0, 1, 1], [], []>} : vector<8x128xbf16>, vector<128x128xbf16>, vector<8x128xf32> -> vector<8x128xf32>
    %c0_13 = arith.constant 0 : index
    %c0_14 = arith.constant 0 : index
    %41 = vector.load %arg5[%c0_13, %c0_14] : memref<1x128xf32, #tpu.memory_space<vmem>>, vector<1x128xf32>
    %42 = vector.shape_cast %41 : vector<1x128xf32> to vector<128xf32>
    %43 = vector.shape_cast %42 : vector<128xf32> to vector<1x128xf32>
    %44 = vector.broadcast %43 : vector<1x128xf32> to vector<8x128xf32>
    %45 = arith.addf %40, %44 : vector<8x128xf32>
    %46 = arith.addf %45, %1 : vector<8x128xf32>
    %c0_15 = arith.constant 0 : index
    %c0_16 = arith.constant 0 : index
    %47 = vector.load %arg6[%c0_15, %c0_16] : memref<1x128xf32, #tpu.memory_space<vmem>>, vector<1x128xf32>
    %48 = vector.shape_cast %47 : vector<1x128xf32> to vector<128xf32>
    %c0_17 = arith.constant 0 : index
    %c0_18 = arith.constant 0 : index
    %49 = vector.load %arg7[%c0_17, %c0_18] : memref<1x128xf32, #tpu.memory_space<vmem>>, vector<1x128xf32>
    %50 = vector.shape_cast %49 : vector<1x128xf32> to vector<128xf32>
    %cst_19 = arith.constant dense<0.000000e+00> : vector<8xf32>
    %51 = vector.multi_reduction <add>, %46, %cst_19 [1] : vector<8x128xf32> to vector<8xf32>
    %52 = vector.shape_cast %51 : vector<8xf32> to vector<8x1xf32>
    %cst_20 = arith.constant 1.280000e+02 : f32
    %53 = vector.broadcast %cst_20 : f32 to vector<8x1xf32>
    %54 = arith.divf %52, %53 : vector<8x1xf32>
    %55 = arith.mulf %46, %46 : vector<8x128xf32>
    %cst_21 = arith.constant dense<0.000000e+00> : vector<8xf32>
    %56 = vector.multi_reduction <add>, %55, %cst_21 [1] : vector<8x128xf32> to vector<8xf32>
    %57 = vector.shape_cast %56 : vector<8xf32> to vector<8x1xf32>
    %cst_22 = arith.constant 1.280000e+02 : f32
    %58 = vector.broadcast %cst_22 : f32 to vector<8x1xf32>
    %59 = arith.divf %57, %58 : vector<8x1xf32>
    %60 = arith.mulf %54, %54 : vector<8x1xf32>
    %61 = arith.subf %59, %60 : vector<8x1xf32>
    %62 = vector.broadcast %54 : vector<8x1xf32> to vector<8x128xf32>
    %63 = arith.subf %46, %62 : vector<8x128xf32>
    %cst_23 = arith.constant 9.99999974E-6 : f32
    %64 = vector.broadcast %cst_23 : f32 to vector<8x1xf32>
    %65 = arith.addf %61, %64 : vector<8x1xf32>
    %66 = math.rsqrt %65 : vector<8x1xf32>
    %67 = vector.broadcast %66 : vector<8x1xf32> to vector<8x128xf32>
    %68 = arith.mulf %63, %67 : vector<8x128xf32>
    %69 = vector.shape_cast %48 : vector<128xf32> to vector<1x128xf32>
    %70 = vector.broadcast %69 : vector<1x128xf32> to vector<8x128xf32>
    %71 = arith.mulf %68, %70 : vector<8x128xf32>
    %72 = vector.shape_cast %50 : vector<128xf32> to vector<1x128xf32>
    %73 = vector.broadcast %72 : vector<1x128xf32> to vector<8x128xf32>
    %74 = arith.addf %71, %73 : vector<8x128xf32>
    %cst_24 = arith.constant 0.000000e+00 : f32
    %75 = vector.broadcast %cst_24 : f32 to vector<8x128xf32>
    %76 = arith.maximumf %74, %75 : vector<8x128xf32>
    %77 = arith.addf %76, %74 : vector<8x128xf32>
    %c0_25 = arith.constant 0 : index
    %c0_26 = arith.constant 0 : index
    %78 = vector.load %arg8[%c0_25, %c0_26] : memref<1x128xf32, #tpu.memory_space<vmem>>, vector<1x128xf32>
    %79 = vector.shape_cast %78 : vector<1x128xf32> to vector<128xf32>
    %c0_27 = arith.constant 0 : index
    %c0_28 = arith.constant 0 : index
    %80 = vector.load %arg9[%c0_27, %c0_28] : memref<1x128xf32, #tpu.memory_space<vmem>>, vector<1x128xf32>
    %81 = vector.shape_cast %80 : vector<1x128xf32> to vector<128xf32>
    %cst_29 = arith.constant dense<0.000000e+00> : vector<8xf32>
    %82 = vector.multi_reduction <add>, %77, %cst_29 [1] : vector<8x128xf32> to vector<8xf32>
    %83 = vector.shape_cast %82 : vector<8xf32> to vector<8x1xf32>
    %cst_30 = arith.constant 1.280000e+02 : f32
    %84 = vector.broadcast %cst_30 : f32 to vector<8x1xf32>
    %85 = arith.divf %83, %84 : vector<8x1xf32>
    %86 = arith.mulf %77, %77 : vector<8x128xf32>
    %cst_31 = arith.constant dense<0.000000e+00> : vector<8xf32>
    %87 = vector.multi_reduction <add>, %86, %cst_31 [1] : vector<8x128xf32> to vector<8xf32>
    %88 = vector.shape_cast %87 : vector<8xf32> to vector<8x1xf32>
    %cst_32 = arith.constant 1.280000e+02 : f32
    %89 = vector.broadcast %cst_32 : f32 to vector<8x1xf32>
    %90 = arith.divf %88, %89 : vector<8x1xf32>
    %91 = arith.mulf %85, %85 : vector<8x1xf32>
    %92 = arith.subf %90, %91 : vector<8x1xf32>
    %93 = vector.broadcast %85 : vector<8x1xf32> to vector<8x128xf32>
    %94 = arith.subf %77, %93 : vector<8x128xf32>
    %cst_33 = arith.constant 9.99999974E-6 : f32
    %95 = vector.broadcast %cst_33 : f32 to vector<8x1xf32>
    %96 = arith.addf %92, %95 : vector<8x1xf32>
    %97 = math.rsqrt %96 : vector<8x1xf32>
    %98 = vector.broadcast %97 : vector<8x1xf32> to vector<8x128xf32>
    %99 = arith.mulf %94, %98 : vector<8x128xf32>
    %100 = vector.shape_cast %79 : vector<128xf32> to vector<1x128xf32>
    %101 = vector.broadcast %100 : vector<1x128xf32> to vector<8x128xf32>
    %102 = arith.mulf %99, %101 : vector<8x128xf32>
    %103 = vector.shape_cast %81 : vector<128xf32> to vector<1x128xf32>
    %104 = vector.broadcast %103 : vector<1x128xf32> to vector<8x128xf32>
    %105 = arith.addf %102, %104 : vector<8x128xf32>
    %106 = arith.truncf %105 : vector<8x128xf32> to vector<8x128xbf16>
    %c0_34 = arith.constant 0 : index
    %c0_35 = arith.constant 0 : index
    %107 = vector.load %arg10[%c0_34, %c0_35] : memref<128x384xbf16, #tpu.memory_space<vmem>>, vector<128x384xbf16>
    %cst_36 = arith.constant dense<0.000000e+00> : vector<8x384xf32>
    %108 = tpu.matmul %106, %107, %cst_36 {dimension_numbers = #tpu.dot_dimension_numbers<[1], [0], [0], [1], [0, 0, 1, 1], [], []>} : vector<8x128xbf16>, vector<128x384xbf16>, vector<8x384xf32> -> vector<8x384xf32>
    %c0_37 = arith.constant 0 : index
    %c0_38 = arith.constant 0 : index
    %109 = vector.load %arg11[%c0_37, %c0_38] : memref<1x384xf32, #tpu.memory_space<vmem>>, vector<1x384xf32>
    %110 = vector.shape_cast %109 : vector<1x384xf32> to vector<384xf32>
    %111 = vector.shape_cast %110 : vector<384xf32> to vector<1x384xf32>
    %112 = vector.broadcast %111 : vector<1x384xf32> to vector<8x384xf32>
    %113 = arith.addf %108, %112 : vector<8x384xf32>
    %114 = vector.shape_cast %113 : vector<8x384xf32> to vector<1x8x384xf32>
    %115 = tpu.transpose %114, [0, 2, 1] : vector<1x8x384xf32> -> vector<1x384x8xf32>
    %116 = vector.extract_strided_slice %115 {offsets = [0, 0, 0], sizes = [1, 128, 8], strides = [1, 1, 1]} : vector<1x384x8xf32> to vector<1x128x8xf32>
    %117 = vector.shape_cast %116 : vector<1x128x8xf32> to vector<8x16x8xf32>
    %118 = vector.extract_strided_slice %115 {offsets = [0, 128, 0], sizes = [1, 128, 8], strides = [1, 1, 1]} : vector<1x384x8xf32> to vector<1x128x8xf32>
    %119 = vector.shape_cast %118 : vector<1x128x8xf32> to vector<8x16x8xf32>
    %120 = vector.extract_strided_slice %115 {offsets = [0, 256, 0], sizes = [1, 128, 8], strides = [1, 1, 1]} : vector<1x384x8xf32> to vector<1x128x8xf32>
    %121 = vector.shape_cast %120 : vector<1x128x8xf32> to vector<8x16x8xf32>
    %122 = tpu.transpose %117, [0, 2, 1] : vector<8x16x8xf32> -> vector<8x8x16xf32>
    %123 = arith.truncf %122 : vector<8x8x16xf32> to vector<8x8x16xbf16>
    %124 = arith.truncf %119 : vector<8x16x8xf32> to vector<8x16x8xbf16>
    "tpu.trace_start"() <{level = 10 : i32, message = "bnd,bdm->bnm"}> : () -> ()
    %cst_39 = arith.constant dense<0.000000e+00> : vector<8x8x8xf32>
    %125 = tpu.matmul %123, %124, %cst_39 {dimension_numbers = #tpu.dot_dimension_numbers<[2], [1], [1], [2], [0, 0, 0, 1, 1, 2], [0], [0]>} : vector<8x8x16xbf16>, vector<8x16x8xbf16>, vector<8x8x8xf32> -> vector<8x8x8xf32>
    "tpu.trace_stop"() : () -> ()
    %cst_40 = arith.constant dense<0xFF800000> : vector<8x8xf32>
    %126 = vector.multi_reduction <maximumf>, %125, %cst_40 [2] : vector<8x8x8xf32> to vector<8x8xf32>
    %127 = vector.shape_cast %126 : vector<8x8xf32> to vector<8x8x1xf32>
    %128 = vector.broadcast %127 : vector<8x8x1xf32> to vector<8x8x8xf32>
    %129 = arith.subf %125, %128 : vector<8x8x8xf32>
    %130 = math.exp %129 : vector<8x8x8xf32>
    %cst_41 = arith.constant dense<0.000000e+00> : vector<8x8xf32>
    %131 = vector.multi_reduction <add>, %130, %cst_41 [2] : vector<8x8x8xf32> to vector<8x8xf32>
    %132 = vector.shape_cast %131 : vector<8x8xf32> to vector<8x8x1xf32>
    %133 = tpu.reciprocal %132 {approx = true} : vector<8x8x1xf32> -> vector<8x8x1xf32>
    %134 = vector.broadcast %133 : vector<8x8x1xf32> to vector<8x8x8xf32>
    %135 = arith.mulf %130, %134 : vector<8x8x8xf32>
    %136 = arith.truncf %121 : vector<8x16x8xf32> to vector<8x16x8xbf16>
    %137 = arith.truncf %135 : vector<8x8x8xf32> to vector<8x8x8xbf16>
    "tpu.trace_start"() <{level = 10 : i32, message = "bdm,bnm->bdn"}> : () -> ()
    %cst_42 = arith.constant dense<0.000000e+00> : vector<8x16x8xf32>
    %138 = tpu.matmul %136, %137, %cst_42 {dimension_numbers = #tpu.dot_dimension_numbers<[2], [2], [1], [1], [0, 0, 0, 1, 1, 1], [0], [0]>} : vector<8x16x8xbf16>, vector<8x8x8xbf16>, vector<8x16x8xf32> -> vector<8x16x8xf32>
    "tpu.trace_stop"() : () -> ()
    %139 = vector.shape_cast %138 : vector<8x16x8xf32> to vector<1x128x8xf32>
    %140 = tpu.transpose %139, [0, 2, 1] : vector<1x128x8xf32> -> vector<1x8x128xf32>
    %141 = vector.shape_cast %140 : vector<1x8x128xf32> to vector<8x128xf32>
    %142 = arith.truncf %141 : vector<8x128xf32> to vector<8x128xbf16>
    %c0_43 = arith.constant 0 : index
    %c0_44 = arith.constant 0 : index
    %143 = vector.load %arg12[%c0_43, %c0_44] : memref<128x128xbf16, #tpu.memory_space<vmem>>, vector<128x128xbf16>
    %cst_45 = arith.constant dense<0.000000e+00> : vector<8x128xf32>
    %144 = tpu.matmul %142, %143, %cst_45 {dimension_numbers = #tpu.dot_dimension_numbers<[1], [0], [0], [1], [0, 0, 1, 1], [], []>} : vector<8x128xbf16>, vector<128x128xbf16>, vector<8x128xf32> -> vector<8x128xf32>
    %c0_46 = arith.constant 0 : index
    %c0_47 = arith.constant 0 : index
    %145 = vector.load %arg13[%c0_46, %c0_47] : memref<1x128xf32, #tpu.memory_space<vmem>>, vector<1x128xf32>
    %146 = vector.shape_cast %145 : vector<1x128xf32> to vector<128xf32>
    %147 = vector.shape_cast %146 : vector<128xf32> to vector<1x128xf32>
    %148 = vector.broadcast %147 : vector<1x128xf32> to vector<8x128xf32>
    %149 = arith.addf %144, %148 : vector<8x128xf32>
    %150 = arith.addf %149, %105 : vector<8x128xf32>
    %c0_48 = arith.constant 0 : index
    %c0_49 = arith.constant 0 : index
    %151 = vector.load %arg14[%c0_48, %c0_49] : memref<1x128xf32, #tpu.memory_space<vmem>>, vector<1x128xf32>
    %152 = vector.shape_cast %151 : vector<1x128xf32> to vector<128xf32>
    %c0_50 = arith.constant 0 : index
    %c0_51 = arith.constant 0 : index
    %153 = vector.load %arg15[%c0_50, %c0_51] : memref<1x128xf32, #tpu.memory_space<vmem>>, vector<1x128xf32>
    %154 = vector.shape_cast %153 : vector<1x128xf32> to vector<128xf32>
    %cst_52 = arith.constant dense<0.000000e+00> : vector<8xf32>
    %155 = vector.multi_reduction <add>, %150, %cst_52 [1] : vector<8x128xf32> to vector<8xf32>
    %156 = vector.shape_cast %155 : vector<8xf32> to vector<8x1xf32>
    %cst_53 = arith.constant 1.280000e+02 : f32
    %157 = vector.broadcast %cst_53 : f32 to vector<8x1xf32>
    %158 = arith.divf %156, %157 : vector<8x1xf32>
    %159 = arith.mulf %150, %150 : vector<8x128xf32>
    %cst_54 = arith.constant dense<0.000000e+00> : vector<8xf32>
    %160 = vector.multi_reduction <add>, %159, %cst_54 [1] : vector<8x128xf32> to vector<8xf32>
    %161 = vector.shape_cast %160 : vector<8xf32> to vector<8x1xf32>
    %cst_55 = arith.constant 1.280000e+02 : f32
    %162 = vector.broadcast %cst_55 : f32 to vector<8x1xf32>
    %163 = arith.divf %161, %162 : vector<8x1xf32>
    %164 = arith.mulf %158, %158 : vector<8x1xf32>
    %165 = arith.subf %163, %164 : vector<8x1xf32>
    %166 = vector.broadcast %158 : vector<8x1xf32> to vector<8x128xf32>
    %167 = arith.subf %150, %166 : vector<8x128xf32>
    %cst_56 = arith.constant 9.99999974E-6 : f32
    %168 = vector.broadcast %cst_56 : f32 to vector<8x1xf32>
    %169 = arith.addf %165, %168 : vector<8x1xf32>
    %170 = math.rsqrt %169 : vector<8x1xf32>
    %171 = vector.broadcast %170 : vector<8x1xf32> to vector<8x128xf32>
    %172 = arith.mulf %167, %171 : vector<8x128xf32>
    %173 = vector.shape_cast %152 : vector<128xf32> to vector<1x128xf32>
    %174 = vector.broadcast %173 : vector<1x128xf32> to vector<8x128xf32>
    %175 = arith.mulf %172, %174 : vector<8x128xf32>
    %176 = vector.shape_cast %154 : vector<128xf32> to vector<1x128xf32>
    %177 = vector.broadcast %176 : vector<1x128xf32> to vector<8x128xf32>
    %178 = arith.addf %175, %177 : vector<8x128xf32>
    %cst_57 = arith.constant 0.000000e+00 : f32
    %179 = vector.broadcast %cst_57 : f32 to vector<8x128xf32>
    %180 = arith.maximumf %178, %179 : vector<8x128xf32>
    %181 = arith.addf %180, %178 : vector<8x128xf32>
    %c0_58 = arith.constant 0 : index
    %c0_59 = arith.constant 0 : index
    %182 = vector.load %arg16[%c0_58, %c0_59] : memref<1x128xf32, #tpu.memory_space<vmem>>, vector<1x128xf32>
    %183 = vector.shape_cast %182 : vector<1x128xf32> to vector<128xf32>
    %c0_60 = arith.constant 0 : index
    %c0_61 = arith.constant 0 : index
    %184 = vector.load %arg17[%c0_60, %c0_61] : memref<1x128xf32, #tpu.memory_space<vmem>>, vector<1x128xf32>
    %185 = vector.shape_cast %184 : vector<1x128xf32> to vector<128xf32>
    %cst_62 = arith.constant dense<0.000000e+00> : vector<8xf32>
    %186 = vector.multi_reduction <add>, %181, %cst_62 [1] : vector<8x128xf32> to vector<8xf32>
    %187 = vector.shape_cast %186 : vector<8xf32> to vector<8x1xf32>
    %cst_63 = arith.constant 1.280000e+02 : f32
    %188 = vector.broadcast %cst_63 : f32 to vector<8x1xf32>
    %189 = arith.divf %187, %188 : vector<8x1xf32>
    %190 = arith.mulf %181, %181 : vector<8x128xf32>
    %cst_64 = arith.constant dense<0.000000e+00> : vector<8xf32>
    %191 = vector.multi_reduction <add>, %190, %cst_64 [1] : vector<8x128xf32> to vector<8xf32>
    %192 = vector.shape_cast %191 : vector<8xf32> to vector<8x1xf32>
    %cst_65 = arith.constant 1.280000e+02 : f32
    %193 = vector.broadcast %cst_65 : f32 to vector<8x1xf32>
    %194 = arith.divf %192, %193 : vector<8x1xf32>
    %195 = arith.mulf %189, %189 : vector<8x1xf32>
    %196 = arith.subf %194, %195 : vector<8x1xf32>
    %197 = vector.broadcast %189 : vector<8x1xf32> to vector<8x128xf32>
    %198 = arith.subf %181, %197 : vector<8x128xf32>
    %cst_66 = arith.constant 9.99999974E-6 : f32
    %199 = vector.broadcast %cst_66 : f32 to vector<8x1xf32>
    %200 = arith.addf %196, %199 : vector<8x1xf32>
    %201 = math.rsqrt %200 : vector<8x1xf32>
    %202 = vector.broadcast %201 : vector<8x1xf32> to vector<8x128xf32>
    %203 = arith.mulf %198, %202 : vector<8x128xf32>
    %204 = vector.shape_cast %183 : vector<128xf32> to vector<1x128xf32>
    %205 = vector.broadcast %204 : vector<1x128xf32> to vector<8x128xf32>
    %206 = arith.mulf %203, %205 : vector<8x128xf32>
    %207 = vector.shape_cast %185 : vector<128xf32> to vector<1x128xf32>
    %208 = vector.broadcast %207 : vector<1x128xf32> to vector<8x128xf32>
    %209 = arith.addf %206, %208 : vector<8x128xf32>
    %210 = vector.shape_cast %209 : vector<8x128xf32> to vector<1x8x128xf32>
    %c0_67 = arith.constant 0 : index
    %c0_68 = arith.constant 0 : index
    %c0_69 = arith.constant 0 : index
    %211 = vector.load %arg18[%c0_67, %c0_68, %c0_69] : memref<1x8x128xf32, #tpu.memory_space<vmem>>, vector<1x8x128xf32>
    tpu.vector_store %arg18[%c0_67, %c0_68, %c0_69], %210 {strides = array<i32>} : memref<1x8x128xf32, #tpu.memory_space<vmem>>, vector<1x8x128xf32>,
    return
  }
  func.func @transform_0(%arg0: i32) -> (i32, i32, i32) {
    %c0_i32 = arith.constant 0 : i32
    %c0_i32_0 = arith.constant 0 : i32
    %c0_i32_1 = arith.constant 0 : i32
    return %arg0, %c0_i32, %c0_i32_0 : i32, i32, i32
  }
  func.func @transform_1(%arg0: i32) -> (i32, i32) {
    %c0_i32 = arith.constant 0 : i32
    %c0_i32_0 = arith.constant 0 : i32
    %c0_i32_1 = arith.constant 0 : i32
    return %c0_i32, %c0_i32_0 : i32, i32
  }
  func.func @transform_2(%arg0: i32) -> (i32, i32) {
    %c0_i32 = arith.constant 0 : i32
    %c0_i32_0 = arith.constant 0 : i32
    %c0_i32_1 = arith.constant 0 : i32
    return %c0_i32, %c0_i32_0 : i32, i32
  }
  func.func @transform_3(%arg0: i32) -> (i32, i32) {
    %c0_i32 = arith.constant 0 : i32
    %c0_i32_0 = arith.constant 0 : i32
    %c0_i32_1 = arith.constant 0 : i32
    return %c0_i32, %c0_i32_0 : i32, i32
  }
  func.func @transform_4(%arg0: i32) -> (i32, i32) {
    %c0_i32 = arith.constant 0 : i32
    %c0_i32_0 = arith.constant 0 : i32
    %c0_i32_1 = arith.constant 0 : i32
    return %c0_i32, %c0_i32_0 : i32, i32
  }
  func.func @transform_5(%arg0: i32) -> (i32, i32) {
    %c0_i32 = arith.constant 0 : i32
    %c0_i32_0 = arith.constant 0 : i32
    %c0_i32_1 = arith.constant 0 : i32
    return %c0_i32, %c0_i32_0 : i32, i32
  }
  func.func @transform_6(%arg0: i32) -> (i32, i32) {
    %c0_i32 = arith.constant 0 : i32
    %c0_i32_0 = arith.constant 0 : i32
    %c0_i32_1 = arith.constant 0 : i32
    return %c0_i32, %c0_i32_0 : i32, i32
  }
  func.func @transform_7(%arg0: i32) -> (i32, i32) {
    %c0_i32 = arith.constant 0 : i32
    %c0_i32_0 = arith.constant 0 : i32
    %c0_i32_1 = arith.constant 0 : i32
    return %c0_i32, %c0_i32_0 : i32, i32
  }
  func.func @transform_8(%arg0: i32) -> (i32, i32) {
    %c0_i32 = arith.constant 0 : i32
    %c0_i32_0 = arith.constant 0 : i32
    %c0_i32_1 = arith.constant 0 : i32
    return %c0_i32, %c0_i32_0 : i32, i32
  }
  func.func @transform_9(%arg0: i32) -> (i32, i32) {
    %c0_i32 = arith.constant 0 : i32
    %c0_i32_0 = arith.constant 0 : i32
    %c0_i32_1 = arith.constant 0 : i32
    return %c0_i32, %c0_i32_0 : i32, i32
  }
  func.func @transform_10(%arg0: i32) -> (i32, i32) {
    %c0_i32 = arith.constant 0 : i32
    %c0_i32_0 = arith.constant 0 : i32
    %c0_i32_1 = arith.constant 0 : i32
    return %c0_i32, %c0_i32_0 : i32, i32
  }
  func.func @transform_11(%arg0: i32) -> (i32, i32) {
    %c0_i32 = arith.constant 0 : i32
    %c0_i32_0 = arith.constant 0 : i32
    %c0_i32_1 = arith.constant 0 : i32
    return %c0_i32, %c0_i32_0 : i32, i32
  }
  func.func @transform_12(%arg0: i32) -> (i32, i32) {
    %c0_i32 = arith.constant 0 : i32
    %c0_i32_0 = arith.constant 0 : i32
    %c0_i32_1 = arith.constant 0 : i32
    return %c0_i32, %c0_i32_0 : i32, i32
  }
  func.func @transform_13(%arg0: i32) -> (i32, i32) {
    %c0_i32 = arith.constant 0 : i32
    %c0_i32_0 = arith.constant 0 : i32
    %c0_i32_1 = arith.constant 0 : i32
    return %c0_i32, %c0_i32_0 : i32, i32
  }
  func.func @transform_14(%arg0: i32) -> (i32, i32) {
    %c0_i32 = arith.constant 0 : i32
    %c0_i32_0 = arith.constant 0 : i32
    %c0_i32_1 = arith.constant 0 : i32
    return %c0_i32, %c0_i32_0 : i32, i32
  }
  func.func @transform_15(%arg0: i32) -> (i32, i32) {
    %c0_i32 = arith.constant 0 : i32
    %c0_i32_0 = arith.constant 0 : i32
    %c0_i32_1 = arith.constant 0 : i32
    return %c0_i32, %c0_i32_0 : i32, i32
  }
  func.func @transform_16(%arg0: i32) -> (i32, i32) {
    %c0_i32 = arith.constant 0 : i32
    %c0_i32_0 = arith.constant 0 : i32
    %c0_i32_1 = arith.constant 0 : i32
    return %c0_i32, %c0_i32_0 : i32, i32
  }
  func.func @transform_17(%arg0: i32) -> (i32, i32, i32) {
    %c0_i32 = arith.constant 0 : i32
    %c0_i32_0 = arith.constant 0 : i32
    %c0_i32_1 = arith.constant 0 : i32
    return %arg0, %c0_i32, %c0_i32_0 : i32, i32, i32
  }
}

</mosaic_0001>

<bundles_post_ra>
// kernel: self_attention.1
= control target key start
LH: loop header
LB: loop body
LE: loop exit
PB: predicated region body
PF: predicated region fallthrough
CT: control target
= control target key end

     0   :  { %s5568_s0 = inlined_call_operand.vmem [shape: f32[2,8,128], index: 0, kind: input, shape index: {}]   ;;  %s5569_s1 = inlined_call_operand.vmem [shape: bf16[128,384], index: 1, kind: input, shape index: {}]   ;;  %s5570_s2 = inlined_call_operand.vmem [shape: f32[1,384], index: 2, kind: input, shape index: {}]   ;;  %s5571_s3 = inlined_call_operand.vmem [shape: bf16[128,128], index: 3, kind: input, shape index: {}]   ;;  %s5572_s4 = inlined_call_operand.vmem [shape: f32[1,128], index: 4, kind: input, shape index: {}]   ;;  %s5573_s5 = inlined_call_operand.vmem [shape: f32[1,128], index: 5, kind: input, shape index: {}]   ;;  %s5574_s6 = inlined_call_operand.vmem [shape: f32[1,128], index: 6, kind: input, shape index: {}]   ;;  %s5575_s7 = inlined_call_operand.vmem [shape: f32[1,128], index: 7, kind: input, shape index: {}]   ;;  %s5576_s8 = inlined_call_operand.vmem [shape: f32[1,128], index: 8, kind: input, shape index: {}]   ;;  %s5577_s9 = inlined_call_operand.vmem [shape: bf16[128,384], index: 9, kind: input, shape index: {}]   ;;  %s5578_s10 = inlined_call_operand.vmem [shape: f32[1,384], index: 10, kind: input, shape index: {}]   ;;  %s5579_s11 = inlined_call_operand.vmem [shape: bf16[128,128], index: 11, kind: input, shape index: {}]   ;;  %s5580_s12 = inlined_call_operand.vmem [shape: f32[1,128], index: 12, kind: input, shape index: {}]   ;;  %s5581_s13 = inlined_call_operand.vmem [shape: f32[1,128], index: 13, kind: input, shape index: {}]   ;;  %s5582_s14 = inlined_call_operand.vmem [shape: f32[1,128], index: 14, kind: input, shape index: {}]   ;;  %s5583_s15 = inlined_call_operand.vmem [shape: f32[1,128], index: 15, kind: input, shape index: {}]   ;;  %s5584_s16 = inlined_call_operand.vmem [shape: f32[1,128], index: 16, kind: input, shape index: {}]   ;;  %s5585_s17 = inlined_call_operand.hbm [shape: f32[2,8,128], index: 17, kind: output, shape index: {}]  }
   0x1   :  { %5594 = sst [smem:[#allocation11_spill]] %s5568_s0 }
   0x2   :  { %5595 = sst [smem:[#allocation12_spill]] %s5569_s1 }
   0x3   :  { %5596 = sst [smem:[#allocation13_spill]] %s5570_s2 }
   0x4   :  { %5597 = sst [smem:[#allocation14_spill]] %s5584_s16 }
   0x5   :  { %5598 = sst [smem:[#allocation15_spill]] %s5585_s17 }
   0x6   :  { %22 = vsyncpa [#allocation3], 0 }
   0x7   :  { %24 = vsyncpa [#allocation3 + $0x1], 0  ;;  %s4940_s24 = smov 0   ;;  %s4942_s25 = smov 0  }
   0x8   :  { %s4944_s26 = smov 0   ;;  %s4946_s27 = smov 0  }
   0x9 LB: > { %5599 = sst [smem:[#allocation5_spill]] %s4832_s24  ;;  %s4961_s28 = sadd.s32 4294967295, %s4844_s27   ;;  %s4844_s27 = sphi %s4946_s27, %s5615_s27   ;;  %s4840_s26 = sphi %s4944_s26, %s5620_s26   ;;  %s4836_s25 = sphi %s4942_s25, %s5619_s25   ;;  %s4832_s24 = sphi %s4940_s24, %s5618_s24  }
   0xa   : > { %5600 = sst [smem:[#allocation6_spill]] %s4840_s26  ;;  %s3935_s29 = sadd.s32 4294967294, %s4844_s27  }
   0xb   : > { %5601 = sst [smem:[#allocation7_spill]] %s4844_s27  ;;  %s4965_s0 = sadd.s32 1, %s4844_s27  }
   0xc   : > { %5602 = sst [smem:[#allocation8_spill]] %s4965_s0  ;;  %s399_s30 = sadd.s32 1, %s4840_s26 }
   0xd   : > { %s396_s18 = ssub.s32 %s4844_s27, %s4965_s0  ;;  %p409_p0 = scmp.ne.s32.totalorder %s4840_s26, %s4836_s25 }
   0xe   : > { %p397_p1 = scmp.eq.s32.totalorder %s396_s18, 0  ;;  %p410_p2 = scmp.eq.s32.totalorder %s4961_s28, 1 }
   0xf   : > { %p415_p3 = scmp.ne.s32.totalorder %s4836_s25, %s4832_s24  ;;  %p416_p4 = scmp.eq.s32.totalorder %s3935_s29, 1 }
  0x10   : > { %s4976_s19 = scalar_select %p397_p1, %s4840_s26, %s399_s30  }
  0x11   : > { %p4978_p5 = por %p410_p2, %p409_p0  ;;  %p4982_p6 = por %p416_p4, %p415_p3 }
  0x12   : > { %5603 = sst [smem:[#allocation9_spill]] %s4976_s19  ;;  %p3938_p7 = scmp.ge.s32.totalorder %s4844_s27, 1 }
  0x13   : > { %s5605_s20 = scalar_select %p4982_p6, 1, 0 }
  0x14   : > { %p489_p8 = scmp.lt.s32.totalorder %s4844_s27, 3 }
  0x15   : > { %5606 = sst [smem:[#allocation10_spill]] %s5605_s20 }
  0x16   : > { %p490_p9 = pnand %p3938_p7, %p489_p8 }
  0x17   : > { %s5607_s23 = sld [smem:[#allocation12_spill]] (!%p490_p9)  ;;  %v4846_v2 = vmov (!%p490_p9), 0   ;;  %p540_p10 = scmp.lt.s32.totalorder (!%p490_p9), %s4961_s28, 1  ;;  %v4847_v20 = vmov (!%p490_p9), 0.0   ;;  %v581_v26 = vlaneseq (!%p490_p9)  ;;  %vm4848_vm0 = vmmov (!%p490_p9), 0  }
  0x18   : > { %493 = sbr.rel (%p490_p9) target bundleno = 4034 (0xfc2), region = 88  ;;  %756 = vmatprep.mubr.bf16.mxu0 (!%p490_p9), %v4846_v2  ;;  %s5608_s30 = sld [smem:[#allocation11_spill]] (!%p490_p9)  ;;  %4151 = vmatprep.subr.bf16.mxu1 (!%p490_p9), %v4847_v20  ;;  %vm1173_vm1 = vcmask (!%p490_p9), 130048   ;;  %vm1518_vm2 = vcmask (!%p490_p9), 64512  }
  0x19   : > { %v5071_v27 = vshrl.u32 (!%p490_p9), %v581_v26, 7  ;;  %s5609_s2 = sld [smem:[#allocation13_spill]] (!%p490_p9)  ;;  %4167 = vmatprep.mubr.msk.bf16.mxu1 (!%p490_p9), %vm4848_vm0, %v4847_v20  ;;  %s4048_s20 = sshll.u32 (!%p490_p9), %s4961_s28, 7 }
  0x1b   : > { %v583_v28 = vsub.s32 (!%p490_p9), 0, %v5071_v27  ;;  %v587_v30 = vsub.s32 (!%p490_p9), 1, %v5071_v27 }
  0x1d   : > { %v4629_v0 = vld [vmem:[%s5607_s23 + $0x4] ss:$12 sps:$4 sm:$0xff] (!%p490_p9)   ;;  %v4631_v1 = vld [vmem:[%s5607_s23] ss:$12 sps:$4 sm:$0xff] (!%p490_p9)   ;;  %v4632_v3 = vld [vmem:[%s5607_s23 + $0x1c] ss:$12 sps:$4 sm:$0xff] (!%p490_p9)  }
  0x1e   : > { %724 = vmatprep.subr.bf16.mxu0 (!%p490_p9), %v4629_v0  ;;  %v4634_v4 = vld [vmem:[%s5607_s23 + $0x18] ss:$12 sps:$4 sm:$0xff] (!%p490_p9)   ;;  %v4635_v5 = vld [vmem:[%s5607_s23 + $0x34] ss:$12 sps:$4 sm:$0xff] (!%p490_p9)   ;;  %v4637_v6 = vld [vmem:[%s5607_s23 + $0x30] ss:$12 sps:$4 sm:$0xff] (!%p490_p9)  }
  0x1f   : > { %725 = vmatpush1.bf16.msra.mxu0 %v4631_v1  ;;  %s541_s29 = scalar_select %p540_p10, %s4961_s28, 1  ;;  %v4638_v7 = vld [vmem:[%s5607_s23 + $0x4c] ss:$12 sps:$4 sm:$0xff]   ;;  %v4640_v8 = vld [vmem:[%s5607_s23 + $0x48] ss:$12 sps:$4 sm:$0xff]  }
  0x20   : > { %726 = vmatprep.subr.bf16.mxu0 %v4632_v3  ;;  %v4641_v9 = vld [vmem:[%s5607_s23 + $0x64] ss:$12 sps:$4 sm:$0xff]   ;;  %v4643_v10 = vld [vmem:[%s5607_s23 + $0x60] ss:$12 sps:$4 sm:$0xff]   ;;  %v4644_v11 = vld [vmem:[%s5607_s23 + $0x7c] ss:$12 sps:$4 sm:$0xff]  }
  0x21   : > { %s3940_s26 = sshll.u32 %s541_s29, 3  ;;  %v4646_v12 = vld [vmem:[%s5607_s23 + $0x78] ss:$12 sps:$4 sm:$0xff]   ;;  %v4647_v13 = vld [vmem:[%s5607_s23 + $0x94] ss:$12 sps:$4 sm:$0xff]   ;;  %s5611_s29 = sld [smem:[#allocation15_spill]] }
  0x22   : > { %v4649_v14 = vld [vmem:[%s5607_s23 + $0x90] ss:$12 sps:$4 sm:$0xff]   ;;  %v4650_v15 = vld [vmem:[%s5607_s23 + $0xac] ss:$12 sps:$4 sm:$0xff]   ;;  %s5039_s16 = scalar_lea.vmem %s5608_s30, %s3940_s26  ;;  %v4652_v16 = vld [vmem:[%s5607_s23 + $0xa8] ss:$12 sps:$4 sm:$0xff]  }
  0x23   : > { %727 = vmatpush1.bf16.msra.mxu0 %v4634_v4  ;;  %v545_v17 = vld [vmem:[%s5039_s16] sm:$0xff]  ;;  %v4653_v19 = vld [vmem:[%s5607_s23 + $0x8] ss:$12 sps:$4 sm:$0xff]   ;;  %v4656_v23 = vld [vmem:[%s5607_s23 + $0x50] ss:$12 sps:$4 sm:$0xff]   ;;  %s537_s26 = sand.u32 1, %s4836_s25  }
  0x24   : > { %728 = vmatprep.subr.bf16.mxu0 %v4635_v5  ;;  %v546_v18 = vpack.c.bf16 %v545_v17, %v545_v17  ;;  %4152 = vmatpush3.bf16.msra.mxu1 %v4653_v19  ;;  %v4654_v21 = vld [vmem:[%s5607_s23 + $0x20] ss:$12 sps:$4 sm:$0xff]   ;;  %v4655_v22 = vld [vmem:[%s5607_s23 + $0x38] ss:$12 sps:$4 sm:$0xff]   ;;  %v4657_v24 = vld [vmem:[%s5607_s23 + $0x68] ss:$12 sps:$4 sm:$0xff]  }
  0x25   : > { %4153 = vmatprep.subr.bf16.mxu1 %v4847_v20  ;;  %v4658_v25 = vld [vmem:[%s5607_s23 + $0x80] ss:$12 sps:$4 sm:$0xff]   ;;  %v4659_v40 = vld [vmem:[%s5607_s23 + $0x98] ss:$12 sps:$4 sm:$0xff]   ;;  %v4660_v41 = vld [vmem:[%s5607_s23 + $0xb0] ss:$12 sps:$4 sm:$0xff]  }
  0x26   : > { %v5077_v29 = vld [vmem:[%s5609_s2] sm:$0x7]  ;;  %s3939_s18 = sshll.u32 %s537_s26, 3  ;;  %s3863_s0 = scalar_lea.sflag [#allocation3], %s537_s26 }
  0x27   : > { %729 = vmatpush1.bf16.msra.mxu0 %v4637_v6  ;;  %v584_v31 = vrot.slane %v5077_v29, %v583_v28  ;;  %v588_v32 = vrot.slane %v5077_v29, %v587_v30  ;;  %s539_s30 = scalar_lea.vmem [#allocation2], %s3939_s18  ;;  %s5526_s2 = scalar_lea.hbm %s5611_s29, %s4048_s20 }
  0x28   : > { %730 = vmatprep.subr.bf16.mxu0 %v4638_v7  ;;  %4154 = vmatpush3.bf16.msra.mxu1 %v4654_v21  ;;  %s3876_s19 = sshll.u32 %s539_s30, 4  ;;  %s4849_s28 = smov [#allocation2]   ;;  %s5528_s19 = int_to_ptr.vmem [resolvable:$true] %s3876_s19 }
  0x29   : > { %4155 = vmatprep.subr.bf16.mxu1 %v4847_v20  ;;  %s4782_s17 = scalar_lea.vmem %s5528_s19, 128  ;;  %s4786_s18 = sshll.u32 %s4849_s28, 4  ;;  %s4787_s18 = int_to_ptr.vmem [resolvable:$false] %s4786_s18 }
  0x2a   : > { %p4783_p11 = scmp.ne.s32.totalorder %s5528_s19, %s4782_s17  ;;  %s4788_s21 = scalar_lea.vmem %s4787_s18, 256 }
  0x2b   : > { %731 = vmatpush1.bf16.msra.mxu0 %v4640_v8  ;;  %p4789_p0 = scmp.lt.s32.totalorder %s5528_s19, %s4787_s18  ;;  %p4790_p1 = scmp.lt.s32.totalorder %s4788_s21, %s4782_s17 }
  0x2c   : > { %732 = vmatprep.subr.bf16.mxu0 %v4641_v9  ;;  %4156 = vmatpush3.bf16.msra.mxu1 %v4655_v22  ;;  %p4784_p12 = pnand %p4783_p11, %p4978_p5 }
  0x2d   : > { %4157 = vmatprep.subr.bf16.mxu1 %v4847_v20  ;;  %p4791_p2 = por %p4790_p1, %p4789_p0 }
  0x2e   : > { %p4785_p13 = pneg %p4784_p12 }
  0x2f   : > { %733 = vmatpush1.bf16.msra.mxu0 %v4643_v10 }
  0x30   : > { %734 = vmatprep.subr.bf16.mxu0 %v4644_v11  ;;  %4158 = vmatpush3.bf16.msra.mxu1 %v4656_v23  ;;  %p4792_p3 = pnand %p4791_p2, %p4785_p13 }
  0x31   : > { %4159 = vmatprep.subr.bf16.mxu1 %v4847_v20 }
  0x33   : > { %735 = vmatpush1.bf16.msra.mxu0 %v4646_v12 }
  0x34   : > { %736 = vmatprep.subr.bf16.mxu0 %v4647_v13  ;;  %4160 = vmatpush3.bf16.msra.mxu1 %v4657_v24 }
  0x35   : > { %4161 = vmatprep.subr.bf16.mxu1 %v4847_v20 }
  0x37   : > { %737 = vmatpush1.bf16.msra.mxu0 %v4649_v14 }
  0x38   : > { %738 = vmatprep.subr.bf16.mxu0 %v4650_v15  ;;  %4162 = vmatpush3.bf16.msra.mxu1 %v4658_v25 }
  0x39   : > { %4163 = vmatprep.subr.bf16.mxu1 %v4847_v20 }
  0x3b   : > { %739 = vmatpush1.bf16.msra.mxu0 %v4652_v16 }
  0x3c   : > { %4195 = vmatprep.subr.bf16.mxu0 %v4847_v20  ;;  %4164 = vmatpush3.bf16.msra.mxu1 %v4659_v40 }
  0x3d   : > { %4165 = vmatprep.subr.bf16.mxu1 %v4847_v20 }
  0x3e   : > { %757 = vmatmul.mubr.bf16.vlgmr.msra.gmra.mrb[0].mxu0 %v546_v18 }
  0x3f   : > { %4197 = vmatprep.mubr.msk.bf16.mxu0 %vm4848_vm0, %v4847_v20 }
  0x40   : > { %4166 = vmatpush3.bf16.msra.mxu1 %v4660_v41 }
  0x41   : > { %4171 = vmatprep.subr.bf16.mxu1 %v4847_v20 }
  0x43   : > { %4168 = vmatmul.mubr.bf16.vlgmr.msra.gmra.mrb[0].mxu1 %v546_v18 }
  0x44   : > { %4173 = vmatprep.mubr.msk.bf16.mxu1 %vm4848_vm0, %v4847_v20 }
 0x111   : > { %v758_v33 = vpop.f32.mrb[0].mxu0 }
 0x112   : > { %v759_v34 = vadd.f32 %v758_v33, %v584_v31  ;;  %v760_v35 = vpop.f32.mrb[1].mxu0 }
 0x113   : > { %v761_v36 = vadd.f32 %v760_v35, %v588_v32  ;;  %v762_v37 = vpop.f32.mrb[2].mxu0 }
 0x114   : > { %v763_v38 = vpop.f32.mrb[3].mxu0 }
 0x115   : > { %v4465_v39 = vpack.i.bf16 %v761_v36, %v759_v34 }
 0x116   : > { %v5102_v34 = vpop.f32.mrb[0].mxu1 }
 0x117   : > { %4466 = vxpose.xlu0.b32.start.end [1/1] (short) %v4465_v39, 128  ;;  %v4169_v35 = vpop.f32.mrb[1].mxu1 }
 0x118   : > { %v802_v36 = vpop.f32.mrb[2].mxu1 }
 0x119   : > { %v4170_v37 = vpop.f32.mrb[3].mxu1 }
 0x197   : > { %v4467_v42 = vpop.trf.xlu0 }
 0x198   : > { %v4468_v43 = vunpack.i.l.bf16 %v4467_v42  ;;  %v4471_v44 = vunpack.i.h.bf16 %v4467_v42 }
 0x19a   : > { %901 = vxpose.xlu0.b32.start [1/2] (short) (narrow) %v4468_v43, 8 }
 0x19b   : > { %v4472_v45 = vpop.trf.xlu0 }
 0x19c   : > { %v4476_v46 = vunpack.i.h.bf16 %v4472_v45  ;;  %v4473_v47 = vunpack.i.l.bf16 %v4472_v45 }
 0x19e   : > { %902 = vxpose.xlu0.b32.end [2/2] (short) (narrow) %v4473_v47, 8  ;;  %v1165_v48 = vpack.c.bf16 %v4476_v46, %v4471_v44 }
 0x19f   : > { %v4477_v49 = vpop.trf.xlu0 }
 0x1a0   : > { %4172 = vmatpush3.bf16.msra.mxu1 %v1165_v48  ;;  %v4478_v50 = vunpack.i.l.bf16 %v4477_v49  ;;  %v4481_v51 = vunpack.i.h.bf16 %v4477_v49 }
 0x1a1   : > { %4177 = vmatprep.subr.bf16.mxu1 %v4847_v20 }
 0x1a2   : > { %933 = vxpose.xlu1.b32.start [1/2] (short) (narrow) %v4478_v50, 8 }
 0x1a3   : > { %v4482_v52 = vpop.trf.xlu0 }
 0x1a4   : > { %v4486_v53 = vunpack.i.h.bf16 %v4482_v52  ;;  %v4483_v54 = vunpack.i.l.bf16 %v4482_v52 }
 0x1a6   : > { %934 = vxpose.xlu1.b32.end [2/2] (short) (narrow) %v4483_v54, 8  ;;  %v1166_v55 = vpack.c.bf16 %v4486_v53, %v4481_v51 }
 0x1a7   : > { %v4487_v56 = vpop.trf.xlu0 }
 0x1a8   : > { %v4488_v57 = vunpack.i.l.bf16 %v4487_v56  ;;  %v4491_v58 = vunpack.i.h.bf16 %v4487_v56 }
 0x1aa   : > { %965 = vxpose.xlu1.b32.start [1/2] (short) (narrow) %v4488_v57, 8 }
 0x1ab   : > { %v4492_v59 = vpop.trf.xlu0 }
 0x1ac   : > { %v4496_v60 = vunpack.i.h.bf16 %v4492_v59  ;;  %v4493_v61 = vunpack.i.l.bf16 %v4492_v59 }
 0x1ae   : > { %966 = vxpose.xlu1.b32.end [2/2] (short) (narrow) %v4493_v61, 8  ;;  %v1167_v62 = vpack.c.bf16 %v4496_v60, %v4491_v58 }
 0x1af   : > { %v4497_v63 = vpop.trf.xlu0 }
 0x1b0   : > { %v4498_v0 = vunpack.i.l.bf16 %v4497_v63  ;;  %v4501_v1 = vunpack.i.h.bf16 %v4497_v63 }
 0x1b2   : > { %997 = vxpose.xlu1.b32.start [1/2] (short) (narrow) %v4498_v0, 8 }
 0x1b3   : > { %v4502_v3 = vpop.trf.xlu0 }
 0x1b4   : > { %v4506_v4 = vunpack.i.h.bf16 %v4502_v3  ;;  %v4503_v5 = vunpack.i.l.bf16 %v4502_v3 }
 0x1b6   : > { %998 = vxpose.xlu1.b32.end [2/2] (short) (narrow) %v4503_v5, 8  ;;  %v1168_v6 = vpack.c.bf16 %v4506_v4, %v4501_v1 }
 0x1b7   : > { %v4507_v7 = vpop.trf.xlu0 }
 0x1b8   : > { %v4508_v8 = vunpack.i.l.bf16 %v4507_v7  ;;  %v4511_v9 = vunpack.i.h.bf16 %v4507_v7 }
 0x1ba   : > { %1029 = vxpose.xlu1.b32.start [1/2] (short) (narrow) %v4508_v8, 8 }
 0x1bb   : > { %v4512_v10 = vpop.trf.xlu0 }
 0x1bc   : > { %v4516_v11 = vunpack.i.h.bf16 %v4512_v10  ;;  %v4513_v12 = vunpack.i.l.bf16 %v4512_v10 }
 0x1be   : > { %1030 = vxpose.xlu1.b32.end [2/2] (short) (narrow) %v4513_v12, 8  ;;  %v1169_v13 = vpack.c.bf16 %v4516_v11, %v4511_v9 }
 0x1bf   : > { %v4517_v14 = vpop.trf.xlu0 }
 0x1c0   : > { %4196 = vmatpush3.bf16.msra.mxu0 %v1169_v13  ;;  %v4518_v15 = vunpack.i.l.bf16 %v4517_v14  ;;  %v4521_v45 = vunpack.i.h.bf16 %v4517_v14 }
 0x1c1   : > { %4207 = vmatprep.subr.bf16.mxu0 %v4847_v20 }
 0x1c2   : > { %1061 = vxpose.xlu1.b32.start [1/2] (short) (narrow) %v4518_v15, 8 }
 0x1c3   : > { %v4522_v16 = vpop.trf.xlu0 }
 0x1c4   : > { %v4523_v17 = vunpack.i.l.bf16 %v4522_v16  ;;  %v4526_v44 = vunpack.i.h.bf16 %v4522_v16 }
 0x1c6   : > { %1062 = vxpose.xlu1.b32.end [2/2] (short) (narrow) %v4523_v17, 8  ;;  %v1170_v48 = vpack.c.bf16 %v4526_v44, %v4521_v45 }
 0x1c7   : > { %v4527_v18 = vpop.trf.xlu0 }
 0x1c8   : > { %v4528_v19 = vunpack.i.l.bf16 %v4527_v18  ;;  %v4531_v21 = vunpack.i.h.bf16 %v4527_v18 }
 0x1ca   : > { %1093 = vxpose.xlu1.b32.start [1/2] (short) (narrow) %v4528_v19, 8 }
 0x1cb   : > { %v4532_v22 = vpop.trf.xlu0 }
 0x1cc   : > { %v4536_v23 = vunpack.i.h.bf16 %v4532_v22  ;;  %v4533_v24 = vunpack.i.l.bf16 %v4532_v22 }
 0x1ce   : > { %1094 = vxpose.xlu1.b32.end [2/2] (short) (narrow) %v4533_v24, 8  ;;  %v1171_v25 = vpack.c.bf16 %v4536_v23, %v4531_v21 }
 0x1cf   : > { %v4537_v26 = vpop.trf.xlu0 }
 0x1d0   : > { %v4538_v31 = vunpack.i.l.bf16 %v4537_v26  ;;  %v4541_v51 = vunpack.i.h.bf16 %v4537_v26 }
 0x1d2   : > { %1125 = vxpose.xlu1.b32.start [1/2] (short) (narrow) %v4538_v31, 8 }
 0x1d3   : > { %v4542_v32 = vpop.trf.xlu0 }
 0x1d4   : > { %v4543_v33 = vunpack.i.l.bf16 %v4542_v32  ;;  %v4546_v52 = vunpack.i.h.bf16 %v4542_v32 }
 0x1d6   : > { %1126 = vxpose.xlu1.b32.end [2/2] (short) (narrow) %v4543_v33, 8 }
 0x21a   : > { %v917_v38 = vpop.trf.xlu0 }
 0x21b   : > { %v1157_v39 = vpack.c.bf16 %v917_v38, %v917_v38 }
 0x21d   : > { %4174 = vmatmul.mubr.msk.bf16.vlgmr.msra.gmra.mrb[4].mxu1 %vm1173_vm1, %v1157_v39 }
 0x21e   : > { %4178 = vmatpush3.bf16.msra.mxu1 %v1166_v55  ;;  %4179 = vmatprep.mubr.msk.bf16.mxu1 %vm4848_vm0, %v4847_v20  ;;  %v1172_v55 = vpack.c.bf16 %v4546_v52, %v4541_v51 }
 0x21f   : > { %4183 = vmatprep.subr.bf16.mxu1 %v4847_v20 }
 0x222   : > { %v949_v40 = vpop.trf.xlu1 }
 0x223   : > { %v1158_v41 = vpack.c.bf16 %v949_v40, %v949_v40 }
 0x225   : > { %4180 = vmatmul.mubr.msk.bf16.vlgmr.msra.gmra.mrb[8].mxu1 %vm1173_vm1, %v1158_v41 }
 0x226   : > { %4184 = vmatpush3.bf16.msra.mxu1 %v1167_v62  ;;  %4185 = vmatprep.mubr.msk.bf16.mxu1 %vm4848_vm0, %v4847_v20 }
 0x227   : > { %4189 = vmatprep.subr.bf16.mxu1 %v4847_v20 }
 0x22a   : > { %v981_v42 = vpop.trf.xlu1 }
 0x22b   : > { %v1159_v43 = vpack.c.bf16 %v981_v42, %v981_v42 }
 0x22d   : > { %4186 = vmatmul.mubr.msk.bf16.vlgmr.msra.gmra.mrb[12].mxu1 %vm1173_vm1, %v1159_v43 }
 0x22e   : > { %4190 = vmatpush3.bf16.msra.mxu1 %v1168_v6  ;;  %4191 = vmatprep.mubr.msk.bf16.mxu1 %vm4848_vm0, %v4847_v20 }
 0x22f   : > { %4201 = vmatprep.subr.bf16.mxu1 %v4847_v20 }
 0x232   : > { %v1013_v46 = vpop.trf.xlu1 }
 0x233   : > { %v1160_v47 = vpack.c.bf16 %v1013_v46, %v1013_v46 }
 0x235   : > { %4192 = vmatmul.mubr.msk.bf16.vlgmr.msra.gmra.mrb[16].mxu1 %vm1173_vm1, %v1160_v47 }
 0x236   : > { %4202 = vmatpush3.bf16.msra.mxu1 %v1170_v48  ;;  %4203 = vmatprep.mubr.msk.bf16.mxu1 %vm4848_vm0, %v4847_v20 }
 0x237   : > { %4213 = vmatprep.subr.bf16.mxu1 %v4847_v20 }
 0x23a   : > { %v1045_v49 = vpop.trf.xlu1 }
 0x23b   : > { %v1161_v50 = vpack.c.bf16 %v1045_v49, %v1045_v49 }
 0x23d   : > { %4198 = vmatmul.mubr.msk.bf16.vlgmr.msra.gmra.mrb[4].mxu0 %vm1173_vm1, %v1161_v50 }
 0x23e   : > { %4208 = vmatpush3.bf16.msra.mxu0 %v1171_v25  ;;  %4209 = vmatprep.mubr.msk.bf16.mxu0 %vm4848_vm0, %v4847_v20 }
 0x23f   : > { %4219 = vmatprep.subr.bf16.mxu0 %v4847_v20 }
 0x242   : > { %v1077_v53 = vpop.trf.xlu1 }
 0x243   : > { %v1162_v54 = vpack.c.bf16 %v1077_v53, %v1077_v53 }
 0x245   : > { %4204 = vmatmul.mubr.msk.bf16.vlgmr.msra.gmra.mrb[20].mxu1 %vm1173_vm1, %v1162_v54 }
 0x246   : > { %4214 = vmatpush3.bf16.msra.mxu1 %v1172_v55  ;;  %4215 = vmatprep.mubr.msk.bf16.mxu1 %vm4848_vm0, %v4847_v20 }
 0x247   : > { %4225 = vmatprep.subr.bf16.mxu1 %v4847_v20 }
 0x24a   : > { %v1109_v56 = vpop.trf.xlu1 }
 0x24b   : > { %v1163_v57 = vpack.c.bf16 %v1109_v56, %v1109_v56 }
 0x24d   : > { %4210 = vmatmul.mubr.msk.bf16.vlgmr.msra.gmra.mrb[8].mxu0 %vm1173_vm1, %v1163_v57 }
 0x24e   : > { %4221 = vmatprep.mubr.msk.bf16.mxu0 %vm4848_vm0, %v4847_v20 }
 0x252   : > { %v1141_v58 = vpop.trf.xlu1 }
 0x253   : > { %v1164_v59 = vpack.c.bf16 %v1141_v58, %v1141_v58 }
 0x255   : > { %4216 = vmatmul.mubr.msk.bf16.vlgmr.msra.gmra.mrb[24].mxu1 %vm1173_vm1, %v1164_v59 }
 0x256   : > { %4227 = vmatprep.mubr.msk.bf16.mxu1 %vm4848_vm0, %v4847_v20 }
 0x2f0   : > { %v1211_v60 = vpop.f32.mrb[4].mxu1 }
 0x2f1   : > { %v1519_v61 = vsel %vm1518_vm2, %v1211_v60, -inf  ;;  %v4175_v62 = vpop.f32.mrb[5].mxu1 }
 0x2f2   : > { %1520 = vmax.xlane.f32.xlu1 %v1519_v61  ;;  %v1214_v63 = vpop.f32.mrb[6].mxu1 }
 0x2f3   : > { %v4176_v0 = vpop.f32.mrb[7].mxu1 }
 0x2f8   : > { %v1254_v1 = vpop.f32.mrb[8].mxu1 }
 0x2f9   : > { %v1522_v3 = vsel %vm1518_vm2, %v1254_v1, -inf  ;;  %v4181_v4 = vpop.f32.mrb[9].mxu1 }
 0x2fa   : > { %1523 = vmax.xlane.f32.xlu0 %v1522_v3  ;;  %v1257_v5 = vpop.f32.mrb[10].mxu1 }
 0x2fb   : > { %v4182_v6 = vpop.f32.mrb[11].mxu1 }
 0x300   : > { %v1297_v7 = vpop.f32.mrb[12].mxu1 }
 0x301   : > { %v1525_v8 = vsel %vm1518_vm2, %v1297_v7, -inf  ;;  %v4187_v9 = vpop.f32.mrb[13].mxu1 }
 0x302   : > { %1526 = vmax.xlane.f32.xlu1 %v1525_v8  ;;  %v1300_v10 = vpop.f32.mrb[14].mxu1 }
 0x303   : > { %v4188_v11 = vpop.f32.mrb[15].mxu1 }
 0x308   : > { %v1340_v12 = vpop.f32.mrb[16].mxu1 }
 0x309   : > { %v1528_v13 = vsel %vm1518_vm2, %v1340_v12, -inf  ;;  %v4193_v14 = vpop.f32.mrb[17].mxu1 }
 0x30a   : > { %1529 = vmax.xlane.f32.xlu1 %v1528_v13  ;;  %v1343_v15 = vpop.f32.mrb[18].mxu1 }
 0x30b   : > { %v4194_v16 = vpop.f32.mrb[19].mxu1 }
 0x310   : > { %v1383_v17 = vpop.f32.mrb[4].mxu0 }
 0x311   : > { %v1531_v18 = vsel %vm1518_vm2, %v1383_v17, -inf  ;;  %v4199_v19 = vpop.f32.mrb[5].mxu0 }
 0x312   : > { %1532 = vmax.xlane.f32.xlu1 %v1531_v18  ;;  %v1386_v21 = vpop.f32.mrb[6].mxu0 }
 0x313   : > { %v4200_v22 = vpop.f32.mrb[7].mxu0  ;;  %v591_v21 = vsub.s32 2, %v5071_v27 }
 0x315   : > { %v592_v22 = vrot.slane %v5077_v29, %v591_v21 }
 0x318   : > { %v1426_v23 = vpop.f32.mrb[20].mxu1 }
 0x319   : > { %v1534_v24 = vsel %vm1518_vm2, %v1426_v23, -inf  ;;  %v4205_v25 = vpop.f32.mrb[21].mxu1 }
 0x31a   : > { %1535 = vmax.xlane.f32.xlu1 %v1534_v24  ;;  %v1429_v26 = vpop.f32.mrb[22].mxu1 }
 0x31b   : > { %v4206_v31 = vpop.f32.mrb[23].mxu1 }
 0x320   : > { %v1469_v32 = vpop.f32.mrb[8].mxu0 }
 0x321   : > { %v4211_v33 = vpop.f32.mrb[9].mxu0  ;;  %v1537_v35 = vsel %vm1518_vm2, %v1469_v32, -inf }
 0x322   : > { %v1472_v36 = vpop.f32.mrb[10].mxu0  ;;  %1538 = vmax.xlane.f32.xlu1 %v1537_v35 }
 0x323   : > { %v4212_v37 = vpop.f32.mrb[11].mxu0 }
 0x328   : > { %v1512_v38 = vpop.f32.mrb[24].mxu1 }
 0x329   : > { %v1540_v39 = vsel %vm1518_vm2, %v1512_v38, -inf  ;;  %v4217_v40 = vpop.f32.mrb[25].mxu1 }
 0x32a   : > { %1541 = vmax.xlane.f32.xlu0 %v1540_v39  ;;  %v1515_v41 = vpop.f32.mrb[26].mxu1 }
 0x32b   : > { %v4218_v42 = vpop.f32.mrb[27].mxu1 }
 0x37f   : > { %v1521_v43 = vpop.xlane.xlu1 %1520 }
 0x380   : > { %v1543_v44 = vsub.f32 %v1211_v60, %v1521_v43 }
 0x382   : > { %v1551_v45 = vmul.f32 1.442695, %v1543_v44 }
 0x384   : > { %4709 = vpow2.f32 %v1551_v45 }
 0x387   : > { %v1524_v46 = vpop.xlane.xlu0 %1523 }
 0x388   : > { %v1544_v47 = vsub.f32 %v1254_v1, %v1524_v46 }
 0x38a   : > { %v1553_v48 = vmul.f32 1.442695, %v1544_v47 }
 0x38c   : > { %4711 = vpow2.f32 %v1553_v48 }
 0x38e   : > { %v4710_v49 = vpop.eup %4709 }
 0x38f   : > { %v1527_v50 = vpop.xlane.xlu1 %1526  ;;  %v1567_v51 = vsel %vm1518_vm2, %v4710_v49, 0.0 }
 0x390   : > { %v1545_v52 = vsub.f32 %v1297_v7, %v1527_v50  ;;  %1568 = vadd.xlane.f32.xlu1 %v1567_v51 }
 0x392   : > { %v1555_v53 = vmul.f32 1.442695, %v1545_v52 }
 0x394   : > { %4713 = vpow2.f32 %v1555_v53 }
 0x396   : > { %v4712_v54 = vpop.eup %4711 }
 0x397   : > { %v1530_v55 = vpop.xlane.xlu1 %1529  ;;  %v1570_v56 = vsel %vm1518_vm2, %v4712_v54, 0.0 }
 0x398   : > { %v1546_v57 = vsub.f32 %v1340_v12, %v1530_v55  ;;  %1571 = vadd.xlane.f32.xlu0 %v1570_v56 }
 0x39a   : > { %v1557_v58 = vmul.f32 1.442695, %v1546_v57 }
 0x39c   : > { %4715 = vpow2.f32 %v1557_v58 }
 0x39e   : > { %v4714_v59 = vpop.eup %4713 }
 0x39f   : > { %v1533_v60 = vpop.xlane.xlu1 %1532  ;;  %v1573_v61 = vsel %vm1518_vm2, %v4714_v59, 0.0 }
 0x3a0   : > { %v1547_v62 = vsub.f32 %v1383_v17, %v1533_v60  ;;  %1574 = vadd.xlane.f32.xlu1 %v1573_v61 }
 0x3a2   : > { %v1559_v63 = vmul.f32 1.442695, %v1547_v62 }
 0x3a4   : > { %4717 = vpow2.f32 %v1559_v63 }
 0x3a6   : > { %v5145_v0 = vpop.eup %4715 }
 0x3a7   : > { %v1536_v1 = vpop.xlane.xlu1 %1535  ;;  %v1576_v3 = vsel %vm1518_vm2, %v5145_v0, 0.0 }
 0x3a8   : > { %v1548_v4 = vsub.f32 %v1426_v23, %v1536_v1  ;;  %1577 = vadd.xlane.f32.xlu0 %v1576_v3  ;;  %v800_v23 = vadd.f32 %v5102_v34, %v592_v22 }
 0x3aa   : > { %v1561_v5 = vmul.f32 1.442695, %v1548_v4 }
 0x3ac   : > { %4719 = vpow2.f32 %v1561_v5 }
 0x3ae   : > { %v5149_v6 = vpop.eup %4717 }
 0x3af   : > { %v1539_v7 = vpop.xlane.xlu1 %1538  ;;  %v1579_v8 = vsel %vm1518_vm2, %v5149_v6, 0.0 }
 0x3b0   : > { %v1549_v9 = vsub.f32 %v1469_v32, %v1539_v7  ;;  %1580 = vadd.xlane.f32.xlu1 %v1579_v8 }
 0x3b2   : > { %v1563_v10 = vmul.f32 1.442695, %v1549_v9 }
 0x3b4   : > { %4721 = vpow2.f32 %v1563_v10 }
 0x3b6   : > { %v5153_v11 = vpop.eup %4719 }
 0x3b7   : > { %v1542_v12 = vpop.xlane.xlu0 %1541  ;;  %v1582_v13 = vsel %vm1518_vm2, %v5153_v11, 0.0 }
 0x3b8   : > { %v1550_v14 = vsub.f32 %v1512_v38, %v1542_v12  ;;  %1583 = vadd.xlane.f32.xlu0 %v1582_v13 }
 0x3ba   : > { %v1565_v15 = vmul.f32 1.442695, %v1550_v14 }
 0x3bc   : > { %4723 = vpow2.f32 %v1565_v15 }
 0x3be   : > { %v5157_v16 = vpop.eup %4721 }
 0x3bf   : > { %v1585_v17 = vsel %vm1518_vm2, %v5157_v16, 0.0 }
 0x3c0   : > { %1586 = vadd.xlane.f32.xlu1 %v1585_v17 }
 0x3c6   : > { %v5161_v18 = vpop.eup %4723 }
 0x3c7   : > { %v1588_v19 = vsel %vm1518_vm2, %v5161_v18, 0.0 }
 0x3c8   : > { %1589 = vadd.xlane.f32.xlu0 %v1588_v19 }
 0x3f3   : > { %869 = vxpose.xlu1.b32.start.end [1/1] (short) %v800_v23, 128 }
 0x41d   : > { %v1569_v24 = vpop.xlane.xlu1 %1568 }
 0x41e   : > { %4725 = vrcp.f32 %v1569_v24 }
 0x425   : > { %v1572_v25 = vpop.xlane.xlu0 %1571 }
 0x426   : > { %4727 = vrcp.f32 %v1572_v25 }
 0x428   : > { %v4726_v26 = vpop.eup %4725 }
 0x429   : > { %v1599_v31 = vmul.f32 %v4726_v26, %v4710_v49 }
 0x42b   : > { %v1615_v32 = vpack.c.bf16 %v1599_v31, %v1599_v31 }
 0x42d   : > { %v1627_v33 = vsel %vm1518_vm2, %v1615_v32, 0  ;;  %v1575_v34 = vpop.xlane.xlu1 %1574 }
 0x42e   : > { %4220 = vmatpush3.bf16.xpose.msra.mxu0 %v1627_v33  ;;  %4729 = vrcp.f32 %v1575_v34  ;;  %v4666_v34 = vld [vmem:[%s5571_s3 + $0x28] sm:$0xff]  }
 0x42f   : > { %4231 = vmatprep.subr.bf16.mxu0 %v4847_v20 }
 0x430   : > { %v4728_v35 = vpop.eup %4727 }
 0x431   : > { %v1600_v36 = vmul.f32 %v4728_v35, %v4712_v54  ;;  %v4661_v35 = vld [vmem:[%s5571_s3] sm:$0xff]  }
 0x433   : > { %v1616_v37 = vpack.c.bf16 %v1600_v36, %v1600_v36  ;;  %v4662_v36 = vld [vmem:[%s5571_s3 + $0x8] sm:$0xff]  }
 0x435   : > { %v1674_v29 = vsel %vm1518_vm2, %v1616_v37, 0  ;;  %v1578_v38 = vpop.xlane.xlu0 %1577  ;;  %v4663_v37 = vld [vmem:[%s5571_s3 + $0x10] sm:$0xff]  }
 0x436   : > { %4226 = vmatpush3.bf16.xpose.msra.mxu1 %v1674_v29  ;;  %4731 = vrcp.f32 %v1578_v38  ;;  %v4665_v29 = vld [vmem:[%s5571_s3 + $0x20] sm:$0xff]   ;;  %v4667_v38 = vld [vmem:[%s5571_s3 + $0x30] sm:$0xff]  }
 0x437   : > { %4237 = vmatprep.subr.bf16.mxu1 %v4847_v20 }
 0x438   : > { %v4730_v40 = vpop.eup %4729 }
 0x439   : > { %v1601_v42 = vmul.f32 %v4730_v40, %v4714_v59 }
 0x43b   : > { %v1617_v44 = vpack.c.bf16 %v1601_v42, %v1601_v42 }
 0x43d   : > { %v1581_v39 = vpop.xlane.xlu1 %1580  ;;  %v1721_v49 = vsel %vm1518_vm2, %v1617_v44, 0 }
 0x43e   : > { %4733 = vrcp.f32 %v1581_v39  ;;  %v4668_v39 = vld [vmem:[%s5571_s3 + $0x38] sm:$0xff]  }
 0x440   : > { %v4732_v45 = vpop.eup %4731 }
 0x441   : > { %v1602_v50 = vmul.f32 %v4732_v45, %v5145_v0 }
 0x443   : > { %v1618_v52 = vpack.c.bf16 %v1602_v50, %v1602_v50 }
 0x445   : > { %v1584_v48 = vpop.xlane.xlu0 %1583  ;;  %v1768_v56 = vsel %vm1518_vm2, %v1618_v52, 0 }
 0x446   : > { %4735 = vrcp.f32 %v1584_v48 }
 0x448   : > { %v4734_v53 = vpop.eup %4733 }
 0x449   : > { %v1603_v57 = vmul.f32 %v4734_v53, %v5149_v6 }
 0x44b   : > { %v1619_v59 = vpack.c.bf16 %v1603_v57, %v1603_v57 }
 0x44d   : > { %v1587_v41 = vpop.xlane.xlu1 %1586  ;;  %v1815_v0 = vsel %vm1518_vm2, %v1619_v59, 0 }
 0x44e   : > { %4737 = vrcp.f32 %v1587_v41 }
 0x450   : > { %v4736_v60 = vpop.eup %4735 }
 0x451   : > { %v1604_v1 = vmul.f32 %v4736_v60, %v5153_v11 }
 0x453   : > { %v1620_v4 = vpack.c.bf16 %v1604_v1, %v1604_v1 }
 0x455   : > { %v1590_v63 = vpop.xlane.xlu0 %1589  ;;  %v1862_v8 = vsel %vm1518_vm2, %v1620_v4, 0 }
 0x456   : > { %4739 = vrcp.f32 %v1590_v63 }
 0x458   : > { %v4738_v5 = vpop.eup %4737 }
 0x459   : > { %v1605_v9 = vmul.f32 %v4738_v5, %v5157_v16 }
 0x45b   : > { %v1621_v11 = vpack.c.bf16 %v1605_v9, %v1605_v9 }
 0x45d   : > { %v1909_v15 = vsel %vm1518_vm2, %v1621_v11, 0  ;;  %v3981_v11 = vld [vmem:[%s5572_s4] ss:$0 sm:$0xff] }
 0x460   : > { %v4740_v12 = vpop.eup %4739 }
 0x461   : > { %v1606_v17 = vmul.f32 %v4740_v12, %v5161_v18 }
 0x463   : > { %v1622_v16 = vpack.c.bf16 %v1606_v17, %v1606_v17  ;;  %v4781_v17 = vld [vmem:[%s5039_s16] sm:$0xff]  ;;  %s5610_s16 = sld [smem:[#allocation14_spill]] }
 0x465   : > { %v1956_v24 = vsel %vm1518_vm2, %v1622_v16, 0 }
 0x473   : > { %v885_v43 = vpop.trf.xlu1 }
 0x477   : > { %v886_v46 = vpop.trf.xlu1 }
 0x478   : > { %v1607_v47 = vpack.c.bf16 %v886_v46, %v885_v43 }
 0x47a   : > { %4222 = vmatmul.mubr.msk.bf16.vlgmr.msra.gmra.mrb[12].mxu0 %vm1518_vm2, %v1607_v47 }
 0x47b   : > { %4232 = vmatpush3.bf16.xpose.msra.mxu0 %v1721_v49  ;;  %v887_v51 = vpop.trf.xlu1  ;;  %4233 = vmatprep.mubr.msk.bf16.mxu0 %vm4848_vm0, %v4847_v20 }
 0x47c   : > { %4243 = vmatprep.subr.bf16.mxu0 %v4847_v20 }
 0x47f   : > { %v888_v54 = vpop.trf.xlu1 }
 0x480   : > { %v1608_v55 = vpack.c.bf16 %v888_v54, %v887_v51 }
 0x482   : > { %4228 = vmatmul.mubr.msk.bf16.vlgmr.msra.gmra.mrb[28].mxu1 %vm1518_vm2, %v1608_v55 }
 0x483   : > { %4238 = vmatpush3.bf16.xpose.msra.mxu1 %v1768_v56  ;;  %v889_v58 = vpop.trf.xlu1  ;;  %4239 = vmatprep.mubr.msk.bf16.mxu1 %vm4848_vm0, %v4847_v20 }
 0x484   : > { %4249 = vmatprep.subr.bf16.mxu1 %v4847_v20 }
 0x487   : > { %v890_v61 = vpop.trf.xlu1 }
 0x488   : > { %v1609_v62 = vpack.c.bf16 %v890_v61, %v889_v58 }
 0x48a   : > { %4234 = vmatmul.mubr.msk.bf16.vlgmr.msra.gmra.mrb[16].mxu0 %vm1518_vm2, %v1609_v62 }
 0x48b   : > { %4244 = vmatpush3.bf16.xpose.msra.mxu0 %v1815_v0  ;;  %v891_v3 = vpop.trf.xlu1  ;;  %4245 = vmatprep.mubr.msk.bf16.mxu0 %vm4848_vm0, %v4847_v20 }
 0x48c   : > { %4255 = vmatprep.subr.bf16.mxu0 %v4847_v20 }
 0x48f   : > { %v892_v6 = vpop.trf.xlu1 }
 0x490   : > { %v1610_v7 = vpack.c.bf16 %v892_v6, %v891_v3 }
 0x492   : > { %4240 = vmatmul.mubr.msk.bf16.vlgmr.msra.gmra.mrb[32].mxu1 %vm1518_vm2, %v1610_v7 }
 0x493   : > { %4250 = vmatpush3.bf16.xpose.msra.mxu1 %v1862_v8  ;;  %v893_v10 = vpop.trf.xlu1  ;;  %4251 = vmatprep.mubr.msk.bf16.mxu1 %vm4848_vm0, %v4847_v20 }
 0x494   : > { %4261 = vmatprep.subr.bf16.mxu1 %v4847_v20 }
 0x497   : > { %v894_v13 = vpop.trf.xlu1 }
 0x498   : > { %v1611_v14 = vpack.c.bf16 %v894_v13, %v893_v10 }
 0x49a   : > { %4246 = vmatmul.mubr.msk.bf16.vlgmr.msra.gmra.mrb[20].mxu0 %vm1518_vm2, %v1611_v14 }
 0x49b   : > { %4256 = vmatpush3.bf16.xpose.msra.mxu0 %v1909_v15  ;;  %v895_v19 = vpop.trf.xlu1  ;;  %4257 = vmatprep.mubr.msk.bf16.mxu0 %vm4848_vm0, %v4847_v20 }
 0x49c   : > { %4267 = vmatprep.subr.bf16.mxu0 %v4847_v20 }
 0x49f   : > { %v896_v22 = vpop.trf.xlu1 }
 0x4a0   : > { %v1612_v23 = vpack.c.bf16 %v896_v22, %v895_v19 }
 0x4a2   : > { %4252 = vmatmul.mubr.msk.bf16.vlgmr.msra.gmra.mrb[36].mxu1 %vm1518_vm2, %v1612_v23  ;;  %v4669_v23 = vld [vmem:[%s5577_s9] ss:$12 sps:$4 sm:$0xff]  }
 0x4a3   : > { %4262 = vmatpush3.bf16.xpose.msra.mxu1 %v1956_v24  ;;  %v897_v25 = vpop.trf.xlu1  ;;  %4263 = vmatprep.mubr.msk.bf16.mxu1 %vm4848_vm0, %v4847_v20  ;;  %v4671_v24 = vld [vmem:[%s5577_s9 + $0x4] ss:$12 sps:$4 sm:$0xff]  }
 0x4a4   : > { %2383 = vmatprep.subr.bf16.mxu1 %v4671_v24 }
 0x4a7   : > { %v898_v18 = vpop.trf.xlu1 }
 0x4a8   : > { %v1613_v26 = vpack.c.bf16 %v898_v18, %v897_v25  ;;  %v4672_v25 = vld [vmem:[%s5577_s9 + $0x8] ss:$12 sps:$4 sm:$0xff]  }
 0x4a9   : > { %v4675_v18 = vld [vmem:[%s5577_s9 + $0x1c] ss:$12 sps:$4 sm:$0xff]  }
 0x4aa   : > { %4258 = vmatmul.mubr.msk.bf16.vlgmr.msra.gmra.mrb[24].mxu0 %vm1518_vm2, %v1613_v26  ;;  %v4673_v26 = vld [vmem:[%s5577_s9 + $0x18] ss:$12 sps:$4 sm:$0xff]  }
 0x4ab   : > { %v899_v31 = vpop.trf.xlu1  ;;  %4283 = vmatprep.mubr.msk.bf16.mxu0 %vm4848_vm0, %v4847_v20  ;;  %4268 = vmatpush3.bf16.msra.mxu0 %v4661_v35 }
 0x4ac   : > { %4269 = vmatprep.subr.bf16.mxu0 %v4847_v20 }
 0x4af   : > { %v900_v32 = vpop.trf.xlu1  ;;  %4270 = vmatpush3.bf16.msra.mxu0 %v4662_v36 }
 0x4b0   : > { %v1614_v33 = vpack.c.bf16 %v900_v32, %v899_v31  ;;  %4271 = vmatprep.subr.bf16.mxu0 %v4847_v20 }
 0x4b2   : > { %4264 = vmatmul.mubr.msk.bf16.vlgmr.msra.gmra.mrb[40].mxu1 %vm1518_vm2, %v1614_v33 }
 0x4b3   : > { %2415 = vmatprep.mubr.bf16.mxu1 %v4846_v2  ;;  %4272 = vmatpush3.bf16.msra.mxu0 %v4663_v37  ;;  %v4664_v2 = vld [vmem:[%s5571_s3 + $0x18] sm:$0xff]  }
 0x4b4   : > { %4273 = vmatprep.subr.bf16.mxu0 %v4847_v20  ;;  %2384 = vmatpush1.bf16.msra.mxu1 %v4669_v23 }
 0x4b5   : > { %2385 = vmatprep.subr.bf16.mxu1 %v4675_v18 }
 0x4b7   : > { %4274 = vmatpush3.bf16.msra.mxu0 %v4664_v2 }
 0x4b8   : > { %4275 = vmatprep.subr.bf16.mxu0 %v4847_v20  ;;  %2386 = vmatpush1.bf16.msra.mxu1 %v4673_v26 }
 0x4bb   : > { %4276 = vmatpush3.bf16.msra.mxu0 %v4665_v29 }
 0x4bc   : > { %4277 = vmatprep.subr.bf16.mxu0 %v4847_v20 }
 0x4bf   : > { %4278 = vmatpush3.bf16.msra.mxu0 %v4666_v34 }
 0x4c0   : > { %4279 = vmatprep.subr.bf16.mxu0 %v4847_v20 }
 0x4c3   : > { %4280 = vmatpush3.bf16.msra.mxu0 %v4667_v38  ;;  %v3990_v38 = vld [vmem:[%s5573_s5] ss:$0 sm:$0xff] }
 0x4c4   : > { %4281 = vmatprep.subr.bf16.mxu0 %v4847_v20 }
 0x4c7   : > { %4282 = vmatpush3.bf16.msra.mxu0 %v4668_v39 }
 0x4c8   : > { %4287 = vmatprep.subr.bf16.mxu0 %v4847_v20 }
 0x54d   : > { %v1663_v40 = vpop.f32.mrb[12].mxu0 }
 0x54e   : > { %v4223_v41 = vpop.f32.mrb[13].mxu0  ;;  %1999 = vxpose.xlu0.b32.start [1/16] (narrow) %v1663_v40, 8  ;;  %v3991_v40 = vld [vmem:[%s5574_s6] ss:$0 sm:$0xff] }
 0x54f   : > { %v1666_v42 = vpop.f32.mrb[14].mxu0 }
 0x550   : > { %v4224_v43 = vpop.f32.mrb[15].mxu0 }
 0x552   : > { %2000 = vxpose.xlu0.b32.cont [2/16] (narrow) %v1666_v42, 8 }
 0x555   : > { %v1710_v44 = vpop.f32.mrb[28].mxu1 }
 0x556   : > { %2001 = vxpose.xlu0.b32.cont [3/16] (narrow) %v1710_v44, 8  ;;  %v4229_v45 = vpop.f32.mrb[29].mxu1 }
 0x557   : > { %v1713_v46 = vpop.f32.mrb[30].mxu1 }
 0x558   : > { %v4230_v47 = vpop.f32.mrb[31].mxu1 }
 0x559   : > { %v4679_v47 = vld [vmem:[%s5577_s9 + $0x34] ss:$12 sps:$4 sm:$0xff]  }
 0x55a   : > { %2002 = vxpose.xlu0.b32.cont [4/16] (narrow) %v1713_v46, 8  ;;  %v4676_v46 = vld [vmem:[%s5577_s9 + $0x20] ss:$12 sps:$4 sm:$0xff]   ;;  %2387 = vmatprep.subr.bf16.mxu1 %v4679_v47 }
 0x55d   : > { %v1757_v48 = vpop.f32.mrb[16].mxu0 }
 0x55e   : > { %v4235_v49 = vpop.f32.mrb[17].mxu0  ;;  %2003 = vxpose.xlu0.b32.cont [5/16] (narrow) %v1757_v48, 8  ;;  %v4677_v48 = vld [vmem:[%s5577_s9 + $0x30] ss:$12 sps:$4 sm:$0xff]  }
 0x55f   : > { %v1760_v50 = vpop.f32.mrb[18].mxu0  ;;  %v4680_v49 = vld [vmem:[%s5577_s9 + $0x38] ss:$12 sps:$4 sm:$0xff]   ;;  %2388 = vmatpush1.bf16.msra.mxu1 %v4677_v48 }
 0x560   : > { %v4236_v51 = vpop.f32.mrb[19].mxu0 }
 0x561   : > { %v4681_v51 = vld [vmem:[%s5577_s9 + $0x48] ss:$12 sps:$4 sm:$0xff]  }
 0x562   : > { %2004 = vxpose.xlu0.b32.cont [6/16] (narrow) %v1760_v50, 8  ;;  %v4683_v50 = vld [vmem:[%s5577_s9 + $0x4c] ss:$12 sps:$4 sm:$0xff]  }
 0x563   : > { %2389 = vmatprep.subr.bf16.mxu1 %v4683_v50 }
 0x564   : > { %2390 = vmatpush1.bf16.msra.mxu1 %v4681_v51 }
 0x565   : > { %v1804_v52 = vpop.f32.mrb[32].mxu1 }
 0x566   : > { %2005 = vxpose.xlu0.b32.cont [7/16] (narrow) %v1804_v52, 8  ;;  %v4241_v53 = vpop.f32.mrb[33].mxu1  ;;  %v4684_v52 = vld [vmem:[%s5577_s9 + $0x50] ss:$12 sps:$4 sm:$0xff]  }
 0x567   : > { %v1807_v54 = vpop.f32.mrb[34].mxu1  ;;  %v4687_v53 = vld [vmem:[%s5577_s9 + $0x64] ss:$12 sps:$4 sm:$0xff]  }
 0x568   : > { %v4242_v55 = vpop.f32.mrb[35].mxu1  ;;  %2391 = vmatprep.subr.bf16.mxu1 %v4687_v53 }
 0x569   : > { %v4688_v55 = vld [vmem:[%s5577_s9 + $0x68] ss:$12 sps:$4 sm:$0xff]  }
 0x56a   : > { %2006 = vxpose.xlu0.b32.cont [8/16] (narrow) %v1807_v54, 8  ;;  %v4685_v54 = vld [vmem:[%s5577_s9 + $0x60] ss:$12 sps:$4 sm:$0xff]  }
 0x56b   : > { %2392 = vmatpush1.bf16.msra.mxu1 %v4685_v54 }
 0x56d   : > { %v1851_v56 = vpop.f32.mrb[20].mxu0 }
 0x56e   : > { %v4247_v57 = vpop.f32.mrb[21].mxu0  ;;  %2007 = vxpose.xlu0.b32.cont [9/16] (narrow) %v1851_v56, 8  ;;  %v4691_v56 = vld [vmem:[%s5577_s9 + $0x7c] ss:$12 sps:$4 sm:$0xff]  }
 0x56f   : > { %v1854_v58 = vpop.f32.mrb[22].mxu0  ;;  %v4689_v57 = vld [vmem:[%s5577_s9 + $0x78] ss:$12 sps:$4 sm:$0xff]   ;;  %2393 = vmatprep.subr.bf16.mxu1 %v4691_v56 }
 0x570   : > { %v4248_v59 = vpop.f32.mrb[23].mxu0  ;;  %2394 = vmatpush1.bf16.msra.mxu1 %v4689_v57 }
 0x571   : > { %v4695_v59 = vld [vmem:[%s5577_s9 + $0x94] ss:$12 sps:$4 sm:$0xff]  }
 0x572   : > { %2008 = vxpose.xlu0.b32.cont [10/16] (narrow) %v1854_v58, 8  ;;  %v4692_v58 = vld [vmem:[%s5577_s9 + $0x80] ss:$12 sps:$4 sm:$0xff]   ;;  %2395 = vmatprep.subr.bf16.mxu1 %v4695_v59 }
 0x575   : > { %v1898_v60 = vpop.f32.mrb[36].mxu1 }
 0x576   : > { %2009 = vxpose.xlu0.b32.cont [11/16] (narrow) %v1898_v60, 8  ;;  %v4253_v61 = vpop.f32.mrb[37].mxu1  ;;  %v4693_v60 = vld [vmem:[%s5577_s9 + $0x90] ss:$12 sps:$4 sm:$0xff]  }
 0x577   : > { %v1901_v62 = vpop.f32.mrb[38].mxu1  ;;  %v4696_v61 = vld [vmem:[%s5577_s9 + $0x98] ss:$12 sps:$4 sm:$0xff]   ;;  %2396 = vmatpush1.bf16.msra.mxu1 %v4693_v60 }
 0x578   : > { %v4254_v63 = vpop.f32.mrb[39].mxu1 }
 0x579   : > { %v4697_v63 = vld [vmem:[%s5577_s9 + $0xa8] ss:$12 sps:$4 sm:$0xff]  }
 0x57a   : > { %2010 = vxpose.xlu0.b32.cont [12/16] (narrow) %v1901_v62, 8  ;;  %v4699_v62 = vld [vmem:[%s5577_s9 + $0xac] ss:$12 sps:$4 sm:$0xff]  }
 0x57b   : > { %2397 = vmatprep.subr.bf16.mxu1 %v4699_v62 }
 0x57c   : > { %2398 = vmatpush1.bf16.msra.mxu1 %v4697_v63 }
 0x57d   : > { %v1945_v0 = vpop.f32.mrb[24].mxu0  ;;  %4307 = vmatprep.subr.bf16.mxu1 %v4847_v20 }
 0x57e   : > { %v4259_v1 = vpop.f32.mrb[25].mxu0  ;;  %2011 = vxpose.xlu0.b32.cont [13/16] (narrow) %v1945_v0, 8  ;;  %v4700_v0 = vld [vmem:[%s5577_s9 + $0xb0] ss:$12 sps:$4 sm:$0xff]  }
 0x57f   : > { %v1948_v3 = vpop.f32.mrb[26].mxu0 }
 0x580   : > { %v4260_v4 = vpop.f32.mrb[27].mxu0 }
 0x582   : > { %2012 = vxpose.xlu0.b32.cont [14/16] (narrow) %v1948_v3, 8 }
 0x585   : > { %v1992_v5 = vpop.f32.mrb[40].mxu1 }
 0x586   : > { %2013 = vxpose.xlu0.b32.cont [15/16] (narrow) %v1992_v5, 8  ;;  %v4265_v6 = vpop.f32.mrb[41].mxu1 }
 0x587   : > { %v1995_v7 = vpop.f32.mrb[42].mxu1 }
 0x588   : > { %v4266_v8 = vpop.f32.mrb[43].mxu1 }
 0x58a   : > { %2014 = vxpose.xlu0.b32.end [16/16] (narrow) %v1995_v7, 8 }
 0x5ce   : > { %v2015_v9 = vpop.trf.xlu0 }
 0x5cf   : > { %v2031_v10 = vpack.c.bf16 %v2015_v9, %v2015_v9 }
 0x5d1   : > { %4284 = vmatmul.mubr.bf16.vlgmr.msra.gmra.mrb[28].mxu0 %v2031_v10 }
 0x5d2   : > { %4303 = vmatprep.mubr.msk.bf16.mxu0 %vm4848_vm0, %v4847_v20  ;;  %4288 = vmatpush3.bf16.msra.mxu0 %v4672_v25 }
 0x5d3   : > { %4289 = vmatprep.subr.bf16.mxu0 %v4847_v20 }
 0x5d6   : > { %4290 = vmatpush3.bf16.msra.mxu0 %v4676_v46 }
 0x5d7   : > { %4291 = vmatprep.subr.bf16.mxu0 %v4847_v20 }
 0x5da   : > { %4292 = vmatpush3.bf16.msra.mxu0 %v4680_v49 }
 0x5db   : > { %4293 = vmatprep.subr.bf16.mxu0 %v4847_v20 }
 0x5de   : > { %4294 = vmatpush3.bf16.msra.mxu0 %v4684_v52 }
 0x5df   : > { %4295 = vmatprep.subr.bf16.mxu0 %v4847_v20 }
 0x5e2   : > { %4296 = vmatpush3.bf16.msra.mxu0 %v4688_v55 }
 0x5e3   : > { %4297 = vmatprep.subr.bf16.mxu0 %v4847_v20 }
 0x5e6   : > { %4298 = vmatpush3.bf16.msra.mxu0 %v4692_v58 }
 0x5e7   : > { %4299 = vmatprep.subr.bf16.mxu0 %v4847_v20 }
 0x5ea   : > { %4300 = vmatpush3.bf16.msra.mxu0 %v4696_v61 }
 0x5eb   : > { %4301 = vmatprep.subr.bf16.mxu0 %v4847_v20 }
 0x5ee   : > { %4302 = vmatpush3.bf16.msra.mxu0 %v4700_v0 }
 0x5ef   : > { %4331 = vmatprep.subr.bf16.mxu0 %v4847_v20 }
 0x6a4   : > { %v2137_v12 = vpop.f32.mrb[28].mxu0 }
 0x6a5   : > { %v2138_v13 = vadd.f32 %v3981_v11, %v2137_v12  ;;  %v4285_v14 = vpop.f32.mrb[29].mxu0  ;;  %v3992_v11 = vld [vmem:[%s5575_s7] ss:$0 sm:$0xff] }
 0x6a6   : > { %v2140_v15 = vpop.f32.mrb[30].mxu0 }
 0x6a7   : > { %v2143_v19 = vadd.f32 %v4781_v17, %v2138_v13  ;;  %v4286_v16 = vpop.f32.mrb[31].mxu0  ;;  %v3993_v13 = vld [vmem:[%s5576_s8] ss:$0 sm:$0xff] }
 0x6a9   : > { %2146 = vadd.xlane.f32.xlu1 %v2143_v19  ;;  %v2150_v22 = vmul.f32 %v2143_v19, %v2143_v19 }
 0x6ab   : > { %2151 = vadd.xlane.f32.xlu0 %v2150_v22 }
 0x736   : > { %v2147_v31 = vpop.xlane.xlu1 %2146 }
 0x737   : > { %v2149_v32 = vmul.f32 0.0078125, %v2147_v31 }
 0x738   : > { %v2152_v33 = vpop.xlane.xlu0 %2151 }
 0x739   : > { %v2154_v35 = vmul.f32 %v2149_v32, %v2149_v32  ;;  %v2153_v36 = vmul.f32 0.0078125, %v2152_v33  ;;  %v2156_v29 = vsub.f32 %v2143_v19, %v2149_v32  ;;  %v5355_v19 = vld [vmem:[%s5578_s10] sm:$0x7] }
 0x73a   : > { %v2243_v16 = vrot.slane %v5355_v19, %v583_v28  ;;  %v2247_v22 = vrot.slane %v5355_v19, %v587_v30 }
 0x73b   : > { %v2155_v37 = vsub.f32 %v2153_v36, %v2154_v35 }
 0x73d   : > { %v2157_v2 = vadd.f32 1e-05, %v2155_v37 }
 0x73f   : > { %4741 = vrsqrt.f32 %v2157_v2 }
 0x749   : > { %v4742_v34 = vpop.eup %4741 }
 0x74a   : > { %v2159_v39 = vmul.f32 %v4742_v34, %v2156_v29 }
 0x74c   : > { %v2166_v41 = vmul.f32 %v3990_v38, %v2159_v39 }
 0x74e   : > { %v2173_v42 = vadd.f32 %v3991_v40, %v2166_v41 }
 0x750   : > { %v2174_v43 = vmax.f32 %v2173_v42, 0.0 }
 0x752   : > { %v2175_v44 = vadd.f32 %v2174_v43, %v2173_v42 }
 0x754   : > { %2178 = vadd.xlane.f32.xlu1 %v2175_v44  ;;  %v2181_v45 = vmul.f32 %v2175_v44, %v2175_v44 }
 0x756   : > { %2182 = vadd.xlane.f32.xlu0 %v2181_v45 }
 0x7e1   : > { %v2179_v1 = vpop.xlane.xlu1 %2178 }
 0x7e2   : > { %v2180_v3 = vmul.f32 0.0078125, %v2179_v1 }
 0x7e3   : > { %v2183_v4 = vpop.xlane.xlu0 %2182 }
 0x7e4   : > { %v2185_v5 = vmul.f32 %v2180_v3, %v2180_v3  ;;  %v2184_v6 = vmul.f32 0.0078125, %v2183_v4  ;;  %v2187_v9 = vsub.f32 %v2175_v44, %v2180_v3 }
 0x7e6   : > { %v2186_v7 = vsub.f32 %v2184_v6, %v2185_v5 }
 0x7e8   : > { %v2188_v8 = vadd.f32 1e-05, %v2186_v7 }
 0x7ea   : > { %4743 = vrsqrt.f32 %v2188_v8 }
 0x7f4   : > { %v4744_v10 = vpop.eup %4743 }
 0x7f5   : > { %v2190_v12 = vmul.f32 %v4744_v10, %v2187_v9 }
 0x7f7   : > { %v2197_v14 = vmul.f32 %v3992_v11, %v2190_v12 }
 0x7f9   : > { %v5344_v15 = vadd.f32 %v3993_v13, %v2197_v14 }
 0x7fb   : > { %v2205_v17 = vpack.c.bf16 %v5344_v15, %v5344_v15 }
 0x7fd   : > { %2416 = vmatmul.mubr.bf16.vlgmr.msra.gmra.mrb[44].mxu1 %v2205_v17  ;;  %4304 = vmatmul.mubr.bf16.vlgmr.msra.gmra.mrb[32].mxu0 %v2205_v17 }
 0x7fe   : > { %4309 = vmatprep.mubr.msk.bf16.mxu1 %vm4848_vm0, %v4847_v20  ;;  %4333 = vmatprep.mubr.msk.bf16.mxu0 %vm4848_vm0, %v4847_v20 }
 0x8d0   : > { %v2417_v23 = vpop.f32.mrb[44].mxu1  ;;  %v5363_v24 = vpop.f32.mrb[32].mxu0 }
 0x8d1   : > { %v2418_v25 = vadd.f32 %v2417_v23, %v2243_v16  ;;  %v2419_v18 = vpop.f32.mrb[45].mxu1  ;;  %v4305_v26 = vpop.f32.mrb[33].mxu0 }
 0x8d2   : > { %v2420_v31 = vadd.f32 %v2419_v18, %v2247_v22  ;;  %v2421_v32 = vpop.f32.mrb[46].mxu1  ;;  %v2461_v33 = vpop.f32.mrb[34].mxu0 }
 0x8d3   : > { %v2422_v35 = vpop.f32.mrb[47].mxu1  ;;  %v4306_v36 = vpop.f32.mrb[35].mxu0 }
 0x8d4   : > { %v4547_v37 = vpack.i.bf16 %v2420_v31, %v2418_v25 }
 0x8d6   : > { %4548 = vxpose.xlu1.b32.start.end [1/1] (short) %v4547_v37, 128 }
 0x956   : > { %v4549_v2 = vpop.trf.xlu1 }
 0x957   : > { %v4550_v29 = vunpack.i.l.bf16 %v4549_v2  ;;  %v4553_v28 = vunpack.i.h.bf16 %v4549_v2 }
 0x959   : > { %2560 = vxpose.xlu0.b32.start [1/2] (short) (narrow) %v4550_v29, 8 }
 0x95a   : > { %v4554_v34 = vpop.trf.xlu1 }
 0x95b   : > { %v4558_v38 = vunpack.i.h.bf16 %v4554_v34  ;;  %v4555_v30 = vunpack.i.l.bf16 %v4554_v34 }
 0x95d   : > { %2561 = vxpose.xlu0.b32.end [2/2] (short) (narrow) %v4555_v30, 8  ;;  %v2824_v39 = vpack.c.bf16 %v4558_v38, %v4553_v28 }
 0x95e   : > { %v4559_v40 = vpop.trf.xlu1 }
 0x95f   : > { %4308 = vmatpush3.bf16.msra.mxu1 %v2824_v39  ;;  %v4560_v41 = vunpack.i.l.bf16 %v4559_v40  ;;  %v4563_v42 = vunpack.i.h.bf16 %v4559_v40 }
 0x960   : > { %4313 = vmatprep.subr.bf16.mxu1 %v4847_v20 }
 0x961   : > { %2592 = vxpose.xlu1.b32.start [1/2] (short) (narrow) %v4560_v41, 8 }
 0x962   : > { %v4564_v43 = vpop.trf.xlu1 }
 0x963   : > { %v4568_v44 = vunpack.i.h.bf16 %v4564_v43  ;;  %v4565_v45 = vunpack.i.l.bf16 %v4564_v43 }
 0x965   : > { %2593 = vxpose.xlu1.b32.end [2/2] (short) (narrow) %v4565_v45, 8  ;;  %v2825_v46 = vpack.c.bf16 %v4568_v44, %v4563_v42 }
 0x966   : > { %v4569_v47 = vpop.trf.xlu1 }
 0x967   : > { %v4570_v48 = vunpack.i.l.bf16 %v4569_v47  ;;  %v4573_v49 = vunpack.i.h.bf16 %v4569_v47 }
 0x969   : > { %2624 = vxpose.xlu0.b32.start [1/2] (short) (narrow) %v4570_v48, 8 }
 0x96a   : > { %v4574_v50 = vpop.trf.xlu1 }
 0x96b   : > { %v4578_v51 = vunpack.i.h.bf16 %v4574_v50  ;;  %v4575_v52 = vunpack.i.l.bf16 %v4574_v50 }
 0x96d   : > { %2625 = vxpose.xlu0.b32.end [2/2] (short) (narrow) %v4575_v52, 8  ;;  %v2826_v53 = vpack.c.bf16 %v4578_v51, %v4573_v49 }
 0x96e   : > { %v4579_v54 = vpop.trf.xlu1 }
 0x96f   : > { %v4580_v55 = vunpack.i.l.bf16 %v4579_v54  ;;  %v4583_v56 = vunpack.i.h.bf16 %v4579_v54 }
 0x971   : > { %2656 = vxpose.xlu0.b32.start [1/2] (short) (narrow) %v4580_v55, 8 }
 0x972   : > { %v4584_v57 = vpop.trf.xlu1 }
 0x973   : > { %v4588_v58 = vunpack.i.h.bf16 %v4584_v57  ;;  %v4585_v59 = vunpack.i.l.bf16 %v4584_v57 }
 0x975   : > { %2657 = vxpose.xlu0.b32.end [2/2] (short) (narrow) %v4585_v59, 8  ;;  %v2827_v60 = vpack.c.bf16 %v4588_v58, %v4583_v56 }
 0x976   : > { %v4589_v61 = vpop.trf.xlu1 }
 0x977   : > { %v4590_v62 = vunpack.i.l.bf16 %v4589_v61  ;;  %v4593_v63 = vunpack.i.h.bf16 %v4589_v61 }
 0x979   : > { %2688 = vxpose.xlu0.b32.start [1/2] (short) (narrow) %v4590_v62, 8 }
 0x97a   : > { %v4594_v0 = vpop.trf.xlu1 }
 0x97b   : > { %v4598_v1 = vunpack.i.h.bf16 %v4594_v0  ;;  %v4595_v3 = vunpack.i.l.bf16 %v4594_v0 }
 0x97d   : > { %2689 = vxpose.xlu0.b32.end [2/2] (short) (narrow) %v4595_v3, 8  ;;  %v2828_v4 = vpack.c.bf16 %v4598_v1, %v4593_v63 }
 0x97e   : > { %v4599_v5 = vpop.trf.xlu1 }
 0x97f   : > { %4332 = vmatpush3.bf16.msra.mxu0 %v2828_v4  ;;  %v4600_v6 = vunpack.i.l.bf16 %v4599_v5  ;;  %v4603_v7 = vunpack.i.h.bf16 %v4599_v5 }
 0x980   : > { %4343 = vmatprep.subr.bf16.mxu0 %v4847_v20 }
 0x981   : > { %2720 = vxpose.xlu0.b32.start [1/2] (short) (narrow) %v4600_v6, 8 }
 0x982   : > { %v4604_v8 = vpop.trf.xlu1 }
 0x983   : > { %v4608_v9 = vunpack.i.h.bf16 %v4604_v8  ;;  %v4605_v10 = vunpack.i.l.bf16 %v4604_v8 }
 0x985   : > { %2721 = vxpose.xlu0.b32.end [2/2] (short) (narrow) %v4605_v10, 8  ;;  %v2829_v11 = vpack.c.bf16 %v4608_v9, %v4603_v7 }
 0x986   : > { %v4609_v12 = vpop.trf.xlu1 }
 0x987   : > { %v4610_v13 = vunpack.i.l.bf16 %v4609_v12  ;;  %v4613_v14 = vunpack.i.h.bf16 %v4609_v12 }
 0x989   : > { %2752 = vxpose.xlu0.b32.start [1/2] (short) (narrow) %v4610_v13, 8 }
 0x98a   : > { %v4614_v17 = vpop.trf.xlu1 }
 0x98b   : > { %v4618_v16 = vunpack.i.h.bf16 %v4614_v17  ;;  %v4615_v22 = vunpack.i.l.bf16 %v4614_v17 }
 0x98d   : > { %2753 = vxpose.xlu0.b32.end [2/2] (short) (narrow) %v4615_v22, 8  ;;  %v2830_v23 = vpack.c.bf16 %v4618_v16, %v4613_v14 }
 0x98e   : > { %v4619_v25 = vpop.trf.xlu1 }
 0x98f   : > { %v4620_v18 = vunpack.i.l.bf16 %v4619_v25  ;;  %v4623_v30 = vunpack.i.h.bf16 %v4619_v25 }
 0x991   : > { %2784 = vxpose.xlu0.b32.start [1/2] (short) (narrow) %v4620_v18, 8 }
 0x992   : > { %v4624_v26 = vpop.trf.xlu1 }
 0x993   : > { %v4625_v31 = vunpack.i.l.bf16 %v4624_v26  ;;  %v4628_v39 = vunpack.i.h.bf16 %v4624_v26 }
 0x995   : > { %2785 = vxpose.xlu0.b32.end [2/2] (short) (narrow) %v4625_v31, 8  ;;  %v2831_v42 = vpack.c.bf16 %v4628_v39, %v4623_v30 }
 0x9d9   : > { %v2576_v32 = vpop.trf.xlu0 }
 0x9da   : > { %v2816_v33 = vpack.c.bf16 %v2576_v32, %v2576_v32 }
 0x9dc   : > { %4310 = vmatmul.mubr.msk.bf16.vlgmr.msra.gmra.mrb[48].mxu1 %vm1173_vm1, %v2816_v33 }
 0x9dd   : > { %4314 = vmatpush3.bf16.msra.mxu1 %v2825_v46  ;;  %4315 = vmatprep.mubr.msk.bf16.mxu1 %vm4848_vm0, %v4847_v20 }
 0x9de   : > { %4319 = vmatprep.subr.bf16.mxu1 %v4847_v20 }
 0x9e1   : > { %v2608_v35 = vpop.trf.xlu1 }
 0x9e2   : > { %v2817_v36 = vpack.c.bf16 %v2608_v35, %v2608_v35 }
 0x9e4   : > { %4316 = vmatmul.mubr.msk.bf16.vlgmr.msra.gmra.mrb[52].mxu1 %vm1173_vm1, %v2817_v36 }
 0x9e5   : > { %4320 = vmatpush3.bf16.msra.mxu1 %v2826_v53  ;;  %4321 = vmatprep.mubr.msk.bf16.mxu1 %vm4848_vm0, %v4847_v20 }
 0x9e6   : > { %4325 = vmatprep.subr.bf16.mxu1 %v4847_v20 }
 0x9e9   : > { %v2640_v37 = vpop.trf.xlu0 }
 0x9ea   : > { %v2818_v2 = vpack.c.bf16 %v2640_v37, %v2640_v37 }
 0x9ec   : > { %4322 = vmatmul.mubr.msk.bf16.vlgmr.msra.gmra.mrb[56].mxu1 %vm1173_vm1, %v2818_v2 }
 0x9ed   : > { %4326 = vmatpush3.bf16.msra.mxu1 %v2827_v60  ;;  %4327 = vmatprep.mubr.msk.bf16.mxu1 %vm4848_vm0, %v4847_v20 }
 0x9ee   : > { %4337 = vmatprep.subr.bf16.mxu1 %v4847_v20 }
 0x9f1   : > { %v2672_v29 = vpop.trf.xlu0 }
 0x9f2   : > { %v2819_v28 = vpack.c.bf16 %v2672_v29, %v2672_v29 }
 0x9f4   : > { %4328 = vmatmul.mubr.msk.bf16.vlgmr.msra.gmra.mrb[60].mxu1 %vm1173_vm1, %v2819_v28 }
 0x9f5   : > { %4338 = vmatpush3.bf16.msra.mxu1 %v2829_v11  ;;  %4339 = vmatprep.mubr.msk.bf16.mxu1 %vm4848_vm0, %v4847_v20 }
 0x9f6   : > { %4349 = vmatprep.subr.bf16.mxu1 %v4847_v20 }
 0x9f9   : > { %v2704_v34 = vpop.trf.xlu0 }
 0x9fa   : > { %v2820_v38 = vpack.c.bf16 %v2704_v34, %v2704_v34 }
 0x9fc   : > { %4334 = vmatmul.mubr.msk.bf16.vlgmr.msra.gmra.mrb[36].mxu0 %vm1173_vm1, %v2820_v38 }
 0x9fd   : > { %4344 = vmatpush3.bf16.msra.mxu0 %v2830_v23  ;;  %4345 = vmatprep.mubr.msk.bf16.mxu0 %vm4848_vm0, %v4847_v20 }
 0x9fe   : > { %4355 = vmatprep.subr.bf16.mxu0 %v4847_v20 }
 0xa01   : > { %v2736_v40 = vpop.trf.xlu0 }
 0xa02   : > { %v2821_v41 = vpack.c.bf16 %v2736_v40, %v2736_v40 }
 0xa04   : > { %4340 = vmatmul.mubr.msk.bf16.vlgmr.msra.gmra.mrb[64].mxu1 %vm1173_vm1, %v2821_v41 }
 0xa05   : > { %4350 = vmatpush3.bf16.msra.mxu1 %v2831_v42  ;;  %4351 = vmatprep.mubr.msk.bf16.mxu1 %vm4848_vm0, %v4847_v20 }
 0xa06   : > { %4361 = vmatprep.subr.bf16.mxu1 %v4847_v20 }
 0xa09   : > { %v2768_v43 = vpop.trf.xlu0 }
 0xa0a   : > { %v2822_v44 = vpack.c.bf16 %v2768_v43, %v2768_v43 }
 0xa0c   : > { %4346 = vmatmul.mubr.msk.bf16.vlgmr.msra.gmra.mrb[40].mxu0 %vm1173_vm1, %v2822_v44 }
 0xa0d   : > { %4357 = vmatprep.mubr.msk.bf16.mxu0 %vm4848_vm0, %v4847_v20 }
 0xa11   : > { %v2800_v45 = vpop.trf.xlu0 }
 0xa12   : > { %v2823_v46 = vpack.c.bf16 %v2800_v45, %v2800_v45 }
 0xa14   : > { %4352 = vmatmul.mubr.msk.bf16.vlgmr.msra.gmra.mrb[68].mxu1 %vm1173_vm1, %v2823_v46 }
 0xa15   : > { %4363 = vmatprep.mubr.msk.bf16.mxu1 %vm4848_vm0, %v4847_v20 }
 0xaaf   : > { %v2869_v47 = vpop.f32.mrb[48].mxu1 }
 0xab0   : > { %v3176_v48 = vsel %vm1518_vm2, %v2869_v47, -inf  ;;  %v4311_v49 = vpop.f32.mrb[49].mxu1 }
 0xab1   : > { %3177 = vmax.xlane.f32.xlu0 %v3176_v48  ;;  %v2872_v50 = vpop.f32.mrb[50].mxu1 }
 0xab2   : > { %v4312_v51 = vpop.f32.mrb[51].mxu1 }
 0xab7   : > { %v2912_v52 = vpop.f32.mrb[52].mxu1 }
 0xab8   : > { %v3179_v53 = vsel %vm1518_vm2, %v2912_v52, -inf  ;;  %v4317_v54 = vpop.f32.mrb[53].mxu1 }
 0xab9   : > { %3180 = vmax.xlane.f32.xlu1 %v3179_v53  ;;  %v2915_v55 = vpop.f32.mrb[54].mxu1 }
 0xaba   : > { %v4318_v56 = vpop.f32.mrb[55].mxu1 }
 0xabf   : > { %v2955_v57 = vpop.f32.mrb[56].mxu1 }
 0xac0   : > { %v3182_v58 = vsel %vm1518_vm2, %v2955_v57, -inf  ;;  %v4323_v59 = vpop.f32.mrb[57].mxu1 }
 0xac1   : > { %3183 = vmax.xlane.f32.xlu0 %v3182_v58  ;;  %v2958_v60 = vpop.f32.mrb[58].mxu1 }
 0xac2   : > { %v4324_v61 = vpop.f32.mrb[59].mxu1 }
 0xac7   : > { %v2998_v62 = vpop.f32.mrb[60].mxu1 }
 0xac8   : > { %v3185_v63 = vsel %vm1518_vm2, %v2998_v62, -inf  ;;  %v4329_v0 = vpop.f32.mrb[61].mxu1 }
 0xac9   : > { %3186 = vmax.xlane.f32.xlu0 %v3185_v63  ;;  %v3001_v1 = vpop.f32.mrb[62].mxu1 }
 0xaca   : > { %v4330_v3 = vpop.f32.mrb[63].mxu1 }
 0xacf   : > { %v3041_v4 = vpop.f32.mrb[36].mxu0 }
 0xad0   : > { %v3188_v5 = vsel %vm1518_vm2, %v3041_v4, -inf  ;;  %v4335_v6 = vpop.f32.mrb[37].mxu0 }
 0xad1   : > { %3189 = vmax.xlane.f32.xlu0 %v3188_v5  ;;  %v3044_v7 = vpop.f32.mrb[38].mxu0  ;;  %v2251_v6 = vrot.slane %v5355_v19, %v591_v21 }
 0xad2   : > { %v4336_v8 = vpop.f32.mrb[39].mxu0 }
 0xad3   : > { %v2459_v7 = vadd.f32 %v5363_v24, %v2251_v6 }
 0xad7   : > { %v3084_v9 = vpop.f32.mrb[64].mxu1 }
 0xad8   : > { %v3191_v10 = vsel %vm1518_vm2, %v3084_v9, -inf  ;;  %v4341_v11 = vpop.f32.mrb[65].mxu1 }
 0xad9   : > { %3192 = vmax.xlane.f32.xlu1 %v3191_v10  ;;  %v3087_v12 = vpop.f32.mrb[66].mxu1 }
 0xada   : > { %v4342_v13 = vpop.f32.mrb[67].mxu1 }
 0xadf   : > { %v3127_v14 = vpop.f32.mrb[40].mxu0 }
 0xae0   : > { %v4347_v17 = vpop.f32.mrb[41].mxu0  ;;  %v3194_v16 = vsel %vm1518_vm2, %v3127_v14, -inf }
 0xae1   : > { %3195 = vmax.xlane.f32.xlu0 %v3194_v16  ;;  %v3130_v22 = vpop.f32.mrb[42].mxu0 }
 0xae2   : > { %v4348_v23 = vpop.f32.mrb[43].mxu0 }
 0xae7   : > { %v3170_v25 = vpop.f32.mrb[68].mxu1 }
 0xae8   : > { %v3197_v18 = vsel %vm1518_vm2, %v3170_v25, -inf  ;;  %v4353_v26 = vpop.f32.mrb[69].mxu1 }
 0xae9   : > { %3198 = vmax.xlane.f32.xlu1 %v3197_v18  ;;  %v3173_v31 = vpop.f32.mrb[70].mxu1 }
 0xaea   : > { %v4354_v32 = vpop.f32.mrb[71].mxu1 }
 0xb3e   : > { %v3178_v33 = vpop.xlane.xlu0 %3177 }
 0xb3f   : > { %v3200_v35 = vsub.f32 %v2869_v47, %v3178_v33 }
 0xb41   : > { %v3208_v36 = vmul.f32 1.442695, %v3200_v35 }
 0xb43   : > { %4745 = vpow2.f32 %v3208_v36 }
 0xb46   : > { %v3181_v37 = vpop.xlane.xlu1 %3180 }
 0xb47   : > { %v3201_v2 = vsub.f32 %v2912_v52, %v3181_v37 }
 0xb49   : > { %v3210_v29 = vmul.f32 1.442695, %v3201_v2 }
 0xb4b   : > { %4747 = vpow2.f32 %v3210_v29 }
 0xb4d   : > { %v4746_v28 = vpop.eup %4745 }
 0xb4e   : > { %v3184_v34 = vpop.xlane.xlu0 %3183  ;;  %v3224_v38 = vsel %vm1518_vm2, %v4746_v28, 0.0 }
 0xb4f   : > { %v3202_v30 = vsub.f32 %v2955_v57, %v3184_v34  ;;  %3225 = vadd.xlane.f32.xlu0 %v3224_v38 }
 0xb51   : > { %v3212_v39 = vmul.f32 1.442695, %v3202_v30 }
 0xb53   : > { %4749 = vpow2.f32 %v3212_v39 }
 0xb55   : > { %v4748_v40 = vpop.eup %4747 }
 0xb56   : > { %v3187_v41 = vpop.xlane.xlu0 %3186  ;;  %v3227_v42 = vsel %vm1518_vm2, %v4748_v40, 0.0 }
 0xb57   : > { %v3203_v43 = vsub.f32 %v2998_v62, %v3187_v41  ;;  %3228 = vadd.xlane.f32.xlu1 %v3227_v42 }
 0xb59   : > { %v3214_v44 = vmul.f32 1.442695, %v3203_v43 }
 0xb5b   : > { %4751 = vpow2.f32 %v3214_v44 }
 0xb5d   : > { %v4750_v45 = vpop.eup %4749 }
 0xb5e   : > { %v3190_v46 = vpop.xlane.xlu0 %3189  ;;  %v3230_v47 = vsel %vm1518_vm2, %v4750_v45, 0.0 }
 0xb5f   : > { %v3204_v48 = vsub.f32 %v3041_v4, %v3190_v46  ;;  %3231 = vadd.xlane.f32.xlu0 %v3230_v47 }
 0xb61   : > { %v3216_v49 = vmul.f32 1.442695, %v3204_v48 }
 0xb63   : > { %4753 = vpow2.f32 %v3216_v49 }
 0xb65   : > { %v5408_v50 = vpop.eup %4751 }
 0xb66   : > { %v3193_v51 = vpop.xlane.xlu1 %3192  ;;  %v3233_v52 = vsel %vm1518_vm2, %v5408_v50, 0.0 }
 0xb67   : > { %v3205_v53 = vsub.f32 %v3084_v9, %v3193_v51  ;;  %3234 = vadd.xlane.f32.xlu1 %v3233_v52 }
 0xb69   : > { %v3218_v54 = vmul.f32 1.442695, %v3205_v53 }
 0xb6b   : > { %4755 = vpow2.f32 %v3218_v54 }
 0xb6d   : > { %v5412_v55 = vpop.eup %4753 }
 0xb6e   : > { %v3196_v56 = vpop.xlane.xlu0 %3195  ;;  %v3236_v57 = vsel %vm1518_vm2, %v5412_v55, 0.0 }
 0xb6f   : > { %v3206_v58 = vsub.f32 %v3127_v14, %v3196_v56  ;;  %3237 = vadd.xlane.f32.xlu0 %v3236_v57 }
 0xb71   : > { %v3220_v59 = vmul.f32 1.442695, %v3206_v58 }
 0xb73   : > { %4757 = vpow2.f32 %v3220_v59 }
 0xb75   : > { %v5416_v60 = vpop.eup %4755 }
 0xb76   : > { %v3199_v61 = vpop.xlane.xlu1 %3198  ;;  %v3239_v62 = vsel %vm1518_vm2, %v5416_v60, 0.0 }
 0xb77   : > { %v3207_v63 = vsub.f32 %v3170_v25, %v3199_v61  ;;  %3240 = vadd.xlane.f32.xlu1 %v3239_v62 }
 0xb79   : > { %v3222_v0 = vmul.f32 1.442695, %v3207_v63 }
 0xb7b   : > { %4759 = vpow2.f32 %v3222_v0 }
 0xb7d   : > { %v5420_v1 = vpop.eup %4757 }
 0xb7e   : > { %v3242_v3 = vsel %vm1518_vm2, %v5420_v1, 0.0 }
 0xb7f   : > { %3243 = vadd.xlane.f32.xlu0 %v3242_v3 }
 0xb85   : > { %v5424_v4 = vpop.eup %4759 }
 0xb86   : > { %v3245_v5 = vsel %vm1518_vm2, %v5424_v4, 0.0 }
 0xb87   : > { %3246 = vadd.xlane.f32.xlu1 %v3245_v5 }
 0xbac   : > { %2528 = vxpose.xlu0.b32.start.end [1/1] (short) %v2459_v7, 128 }
 0xbdc   : > { %v3226_v8 = vpop.xlane.xlu0 %3225 }
 0xbdd   : > { %4761 = vrcp.f32 %v3226_v8 }
 0xbe4   : > { %v3229_v9 = vpop.xlane.xlu1 %3228 }
 0xbe5   : > { %4763 = vrcp.f32 %v3229_v9 }
 0xbe7   : > { %v4762_v10 = vpop.eup %4761 }
 0xbe8   : > { %v3256_v11 = vmul.f32 %v4762_v10, %v4746_v28  ;;  %v4701_v10 = vld [vmem:[%s5579_s11] sm:$0xff]  }
 0xbea   : > { %v3272_v12 = vpack.c.bf16 %v3256_v11, %v3256_v11  ;;  %v4702_v11 = vld [vmem:[%s5579_s11 + $0x8] sm:$0xff]  }
 0xbec   : > { %v3284_v13 = vsel %vm1518_vm2, %v3272_v12, 0  ;;  %v3232_v19 = vpop.xlane.xlu0 %3231  ;;  %v4703_v12 = vld [vmem:[%s5579_s11 + $0x10] sm:$0xff]  }
 0xbed   : > { %4356 = vmatpush3.bf16.xpose.msra.mxu0 %v3284_v13  ;;  %4765 = vrcp.f32 %v3232_v19  ;;  %v4704_v13 = vld [vmem:[%s5579_s11 + $0x18] sm:$0xff]  }
 0xbee   : > { %4367 = vmatprep.subr.bf16.mxu0 %v4847_v20 }
 0xbef   : > { %v4764_v14 = vpop.eup %4763 }
 0xbf0   : > { %v3257_v17 = vmul.f32 %v4764_v14, %v4748_v40  ;;  %v4705_v14 = vld [vmem:[%s5579_s11 + $0x20] sm:$0xff]  }
 0xbf2   : > { %v3273_v27 = vpack.c.bf16 %v3257_v17, %v3257_v17  ;;  %v4706_v17 = vld [vmem:[%s5579_s11 + $0x28] sm:$0xff]  }
 0xbf4   : > { %v3331_v21 = vsel %vm1518_vm2, %v3273_v27, 0  ;;  %v3235_v24 = vpop.xlane.xlu1 %3234  ;;  %v4707_v27 = vld [vmem:[%s5579_s11 + $0x30] sm:$0xff]  }
 0xbf5   : > { %4362 = vmatpush3.bf16.xpose.msra.mxu1 %v3331_v21  ;;  %4767 = vrcp.f32 %v3235_v24  ;;  %v4708_v21 = vld [vmem:[%s5579_s11 + $0x38] sm:$0xff]  }
 0xbf6   : > { %4373 = vmatprep.subr.bf16.mxu1 %v4847_v20 }
 0xbf7   : > { %v4766_v22 = vpop.eup %4765 }
 0xbf8   : > { %v3258_v25 = vmul.f32 %v4766_v22, %v4750_v45 }
 0xbfa   : > { %v3274_v26 = vpack.c.bf16 %v3258_v25, %v3258_v25 }
 0xbfc   : > { %v3238_v16 = vpop.xlane.xlu0 %3237  ;;  %v3378_v36 = vsel %vm1518_vm2, %v3274_v26, 0 }
 0xbfd   : > { %4769 = vrcp.f32 %v3238_v16 }
 0xbff   : > { %v4768_v31 = vpop.eup %4767 }
 0xc00   : > { %v3259_v37 = vmul.f32 %v4768_v31, %v5408_v50 }
 0xc02   : > { %v3275_v29 = vpack.c.bf16 %v3259_v37, %v3259_v37 }
 0xc04   : > { %v3241_v35 = vpop.xlane.xlu1 %3240  ;;  %v3425_v30 = vsel %vm1518_vm2, %v3275_v29, 0 }
 0xc05   : > { %4771 = vrcp.f32 %v3241_v35 }
 0xc07   : > { %v4770_v28 = vpop.eup %4769 }
 0xc08   : > { %v3260_v39 = vmul.f32 %v4770_v28, %v5412_v55 }
 0xc0a   : > { %v3276_v41 = vpack.c.bf16 %v3260_v39, %v3260_v39 }
 0xc0c   : > { %v3244_v23 = vpop.xlane.xlu0 %3243  ;;  %v3472_v46 = vsel %vm1518_vm2, %v3276_v41, 0 }
 0xc0d   : > { %4773 = vrcp.f32 %v3244_v23 }
 0xc0f   : > { %v4772_v42 = vpop.eup %4771 }
 0xc10   : > { %v3261_v47 = vmul.f32 %v4772_v42, %v5416_v60 }
 0xc12   : > { %v3277_v49 = vpack.c.bf16 %v3261_v47, %v3261_v47 }
 0xc14   : > { %v3247_v45 = vpop.xlane.xlu1 %3246  ;;  %v3519_v53 = vsel %vm1518_vm2, %v3277_v49, 0 }
 0xc15   : > { %4775 = vrcp.f32 %v3247_v45 }
 0xc17   : > { %v4774_v50 = vpop.eup %4773 }
 0xc18   : > { %v3262_v54 = vmul.f32 %v4774_v50, %v5420_v1 }
 0xc1a   : > { %v3278_v56 = vpack.c.bf16 %v3262_v54, %v3262_v54 }
 0xc1c   : > { %v3566_v60 = vsel %vm1518_vm2, %v3278_v56, 0 }
 0xc1f   : > { %v4776_v57 = vpop.eup %4775 }
 0xc20   : > { %v3263_v61 = vmul.f32 %v4776_v57, %v5424_v4 }
 0xc22   : > { %v3279_v63 = vpack.c.bf16 %v3263_v61, %v3263_v61 }
 0xc24   : > { %v3613_v3 = vsel %vm1518_vm2, %v3279_v63, 0 }
 0xc2c   : > { %v2544_v18 = vpop.trf.xlu0 }
 0xc30   : > { %v2545_v32 = vpop.trf.xlu0 }
 0xc31   : > { %v3264_v33 = vpack.c.bf16 %v2545_v32, %v2544_v18 }
 0xc33   : > { %4358 = vmatmul.mubr.msk.bf16.vlgmr.msra.gmra.mrb[44].mxu0 %vm1518_vm2, %v3264_v33 }
 0xc34   : > { %4368 = vmatpush3.bf16.xpose.msra.mxu0 %v3378_v36  ;;  %v2546_v2 = vpop.trf.xlu0  ;;  %4369 = vmatprep.mubr.msk.bf16.mxu0 %vm4848_vm0, %v4847_v20 }
 0xc35   : > { %4379 = vmatprep.subr.bf16.mxu0 %v4847_v20 }
 0xc38   : > { %v2547_v34 = vpop.trf.xlu0 }
 0xc39   : > { %v3265_v38 = vpack.c.bf16 %v2547_v34, %v2546_v2 }
 0xc3b   : > { %4364 = vmatmul.mubr.msk.bf16.vlgmr.msra.gmra.mrb[72].mxu1 %vm1518_vm2, %v3265_v38 }
 0xc3c   : > { %4374 = vmatpush3.bf16.xpose.msra.mxu1 %v3425_v30  ;;  %v2548_v40 = vpop.trf.xlu0  ;;  %4375 = vmatprep.mubr.msk.bf16.mxu1 %vm4848_vm0, %v4847_v20 }
 0xc3d   : > { %4385 = vmatprep.subr.bf16.mxu1 %v4847_v20 }
 0xc40   : > { %v2549_v43 = vpop.trf.xlu0 }
 0xc41   : > { %v3266_v44 = vpack.c.bf16 %v2549_v43, %v2548_v40 }
 0xc43   : > { %4370 = vmatmul.mubr.msk.bf16.vlgmr.msra.gmra.mrb[48].mxu0 %vm1518_vm2, %v3266_v44 }
 0xc44   : > { %4380 = vmatpush3.bf16.xpose.msra.mxu0 %v3472_v46  ;;  %v2550_v48 = vpop.trf.xlu0  ;;  %4381 = vmatprep.mubr.msk.bf16.mxu0 %vm4848_vm0, %v4847_v20 }
 0xc45   : > { %4391 = vmatprep.subr.bf16.mxu0 %v4847_v20 }
 0xc48   : > { %v2551_v51 = vpop.trf.xlu0 }
 0xc49   : > { %v3267_v52 = vpack.c.bf16 %v2551_v51, %v2550_v48 }
 0xc4b   : > { %4376 = vmatmul.mubr.msk.bf16.vlgmr.msra.gmra.mrb[76].mxu1 %vm1518_vm2, %v3267_v52  ;;  %v4034_v52 = vld [vmem:[%s5580_s12] ss:$0 sm:$0xff] }
 0xc4c   : > { %4386 = vmatpush3.bf16.xpose.msra.mxu1 %v3519_v53  ;;  %v2552_v55 = vpop.trf.xlu0  ;;  %4387 = vmatprep.mubr.msk.bf16.mxu1 %vm4848_vm0, %v4847_v20 }
 0xc4d   : > { %4397 = vmatprep.subr.bf16.mxu1 %v4847_v20 }
 0xc50   : > { %v2553_v58 = vpop.trf.xlu0 }
 0xc51   : > { %v3268_v59 = vpack.c.bf16 %v2553_v58, %v2552_v55 }
 0xc53   : > { %4382 = vmatmul.mubr.msk.bf16.vlgmr.msra.gmra.mrb[52].mxu0 %vm1518_vm2, %v3268_v59 }
 0xc54   : > { %4392 = vmatpush3.bf16.xpose.msra.mxu0 %v3566_v60  ;;  %v2554_v62 = vpop.trf.xlu0  ;;  %4393 = vmatprep.mubr.msk.bf16.mxu0 %vm4848_vm0, %v4847_v20 }
 0xc55   : > { %4403 = vmatprep.subr.bf16.mxu0 %v4847_v20 }
 0xc58   : > { %v2555_v0 = vpop.trf.xlu0 }
 0xc59   : > { %v3269_v1 = vpack.c.bf16 %v2555_v0, %v2554_v62 }
 0xc5b   : > { %4388 = vmatmul.mubr.msk.bf16.vlgmr.msra.gmra.mrb[80].mxu1 %vm1518_vm2, %v3269_v1 }
 0xc5c   : > { %4398 = vmatpush3.bf16.xpose.msra.mxu1 %v3613_v3  ;;  %v2556_v5 = vpop.trf.xlu0  ;;  %4399 = vmatprep.mubr.msk.bf16.mxu1 %vm4848_vm0, %v4847_v20 }
 0xc60   : > { %v2557_v4 = vpop.trf.xlu0 }
 0xc61   : > { %v3270_v6 = vpack.c.bf16 %v2557_v4, %v2556_v5 }
 0xc63   : > { %4394 = vmatmul.mubr.msk.bf16.vlgmr.msra.gmra.mrb[56].mxu0 %vm1518_vm2, %v3270_v6  ;;  %v4043_v6 = vld [vmem:[%s5581_s13] ss:$0 sm:$0xff] }
 0xc64   : > { %v2558_v7 = vpop.trf.xlu0  ;;  %4419 = vmatprep.mubr.msk.bf16.mxu0 %vm4848_vm0, %v4847_v20  ;;  %4404 = vmatpush3.bf16.msra.mxu0 %v4701_v10 }
 0xc65   : > { %4405 = vmatprep.subr.bf16.mxu0 %v4847_v20 }
 0xc68   : > { %v2559_v8 = vpop.trf.xlu0  ;;  %4406 = vmatpush3.bf16.msra.mxu0 %v4702_v11 }
 0xc69   : > { %v3271_v9 = vpack.c.bf16 %v2559_v8, %v2558_v7  ;;  %4407 = vmatprep.subr.bf16.mxu0 %v4847_v20 }
 0xc6b   : > { %4400 = vmatmul.mubr.msk.bf16.vlgmr.msra.gmra.mrb[84].mxu1 %vm1518_vm2, %v3271_v9 }
 0xc6c   : > { %4408 = vmatpush3.bf16.msra.mxu0 %v4703_v12 }
 0xc6d   : > { %4409 = vmatprep.subr.bf16.mxu0 %v4847_v20 }
 0xc70   : > { %4410 = vmatpush3.bf16.msra.mxu0 %v4704_v13 }
 0xc71   : > { %4411 = vmatprep.subr.bf16.mxu0 %v4847_v20 }
 0xc74   : > { %4412 = vmatpush3.bf16.msra.mxu0 %v4705_v14 }
 0xc75   : > { %4413 = vmatprep.subr.bf16.mxu0 %v4847_v20 }
 0xc78   : > { %4414 = vmatpush3.bf16.msra.mxu0 %v4706_v17 }
 0xc79   : > { %4415 = vmatprep.subr.bf16.mxu0 %v4847_v20 }
 0xc7c   : > { %4416 = vmatpush3.bf16.msra.mxu0 %v4707_v27 }
 0xc7d   : > { %4417 = vmatprep.subr.bf16.mxu0 %v4847_v20 }
 0xc80   : > { %4418 = vmatpush3.bf16.msra.mxu0 %v4708_v21 }
 0xd06   : > { %v3320_v19 = vpop.f32.mrb[44].mxu0 }
 0xd07   : > { %3656 = vxpose.xlu1.b32.start [1/16] (narrow) %v3320_v19, 8  ;;  %v4359_v24 = vpop.f32.mrb[45].mxu0 }
 0xd08   : > { %v3323_v16 = vpop.f32.mrb[46].mxu0 }
 0xd09   : > { %v4360_v22 = vpop.f32.mrb[47].mxu0 }
 0xd0b   : > { %3657 = vxpose.xlu1.b32.cont [2/16] (narrow) %v3323_v16, 8 }
 0xd0e   : > { %v3367_v23 = vpop.f32.mrb[72].mxu1 }
 0xd0f   : > { %3658 = vxpose.xlu1.b32.cont [3/16] (narrow) %v3367_v23, 8  ;;  %v4365_v25 = vpop.f32.mrb[73].mxu1  ;;  %v4045_v23 = vld [vmem:[%s5583_s15] ss:$0 sm:$0xff] }
 0xd10   : > { %v3370_v18 = vpop.f32.mrb[74].mxu1 }
 0xd11   : > { %v4366_v26 = vpop.f32.mrb[75].mxu1 }
 0xd13   : > { %3659 = vxpose.xlu1.b32.cont [4/16] (narrow) %v3370_v18, 8  ;;  %v4046_v18 = vld [vmem:[%s5610_s16] ss:$0 sm:$0xff] }
 0xd16   : > { %v3414_v31 = vpop.f32.mrb[48].mxu0 }
 0xd17   : > { %3660 = vxpose.xlu1.b32.cont [5/16] (narrow) %v3414_v31, 8  ;;  %v4371_v32 = vpop.f32.mrb[49].mxu0 }
 0xd18   : > { %v3417_v33 = vpop.f32.mrb[50].mxu0 }
 0xd19   : > { %v4372_v35 = vpop.f32.mrb[51].mxu0 }
 0xd1b   : > { %3661 = vxpose.xlu1.b32.cont [6/16] (narrow) %v3417_v33, 8 }
 0xd1e   : > { %v3461_v20 = vpop.f32.mrb[76].mxu1 }
 0xd1f   : > { %3662 = vxpose.xlu1.b32.cont [7/16] (narrow) %v3461_v20, 8  ;;  %v4377_v36 = vpop.f32.mrb[77].mxu1 }
 0xd20   : > { %v3464_v37 = vpop.f32.mrb[78].mxu1 }
 0xd21   : > { %v4378_v2 = vpop.f32.mrb[79].mxu1 }
 0xd23   : > { %3663 = vxpose.xlu1.b32.cont [8/16] (narrow) %v3464_v37, 8 }
 0xd26   : > { %v3508_v29 = vpop.f32.mrb[52].mxu0 }
 0xd27   : > { %3664 = vxpose.xlu1.b32.cont [9/16] (narrow) %v3508_v29, 8  ;;  %v4383_v28 = vpop.f32.mrb[53].mxu0 }
 0xd28   : > { %v3511_v34 = vpop.f32.mrb[54].mxu0 }
 0xd29   : > { %v4384_v38 = vpop.f32.mrb[55].mxu0 }
 0xd2b   : > { %3665 = vxpose.xlu1.b32.cont [10/16] (narrow) %v3511_v34, 8 }
 0xd2e   : > { %v3555_v30 = vpop.f32.mrb[80].mxu1 }
 0xd2f   : > { %3666 = vxpose.xlu1.b32.cont [11/16] (narrow) %v3555_v30, 8  ;;  %v4389_v39 = vpop.f32.mrb[81].mxu1 }
 0xd30   : > { %v3558_v40 = vpop.f32.mrb[82].mxu1 }
 0xd31   : > { %v4390_v41 = vpop.f32.mrb[83].mxu1 }
 0xd33   : > { %3667 = vxpose.xlu1.b32.cont [12/16] (narrow) %v3558_v40, 8 }
 0xd36   : > { %v3602_v42 = vpop.f32.mrb[56].mxu0 }
 0xd37   : > { %3668 = vxpose.xlu1.b32.cont [13/16] (narrow) %v3602_v42, 8  ;;  %v4395_v43 = vpop.f32.mrb[57].mxu0 }
 0xd38   : > { %v3605_v44 = vpop.f32.mrb[58].mxu0 }
 0xd39   : > { %v4396_v45 = vpop.f32.mrb[59].mxu0 }
 0xd3b   : > { %3669 = vxpose.xlu1.b32.cont [14/16] (narrow) %v3605_v44, 8 }
 0xd3e   : > { %v3649_v46 = vpop.f32.mrb[84].mxu1 }
 0xd3f   : > { %3670 = vxpose.xlu1.b32.cont [15/16] (narrow) %v3649_v46, 8  ;;  %v4401_v47 = vpop.f32.mrb[85].mxu1 }
 0xd40   : > { %v3652_v48 = vpop.f32.mrb[86].mxu1 }
 0xd41   : > { %v4402_v49 = vpop.f32.mrb[87].mxu1 }
 0xd43   : > { %3671 = vxpose.xlu1.b32.end [16/16] (narrow) %v3652_v48, 8 }
 0xd87   : > { %v3672_v50 = vpop.trf.xlu1 }
 0xd88   : > { %v3688_v51 = vpack.c.bf16 %v3672_v50, %v3672_v50 }
 0xd8a   : > { %4420 = vmatmul.mubr.bf16.vlgmr.msra.gmra.mrb[60].mxu0 %v3688_v51 }
 0xe5d   : > { %v3794_v53 = vpop.f32.mrb[60].mxu0 }
 0xe5e   : > { %v3795_v54 = vadd.f32 %v4034_v52, %v3794_v53  ;;  %v4421_v55 = vpop.f32.mrb[61].mxu0 }
 0xe5f   : > { %v3797_v56 = vpop.f32.mrb[62].mxu0 }
 0xe60   : > { %v3800_v57 = vadd.f32 %v3795_v54, %v5344_v15  ;;  %v4422_v58 = vpop.f32.mrb[63].mxu0  ;;  %v4044_v15 = vld [vmem:[%s5582_s14] ss:$0 sm:$0xff] }
 0xe62   : > { %3803 = vadd.xlane.f32.xlu0 %v3800_v57  ;;  %v3806_v59 = vmul.f32 %v3800_v57, %v3800_v57 }
 0xe64   : > { %3807 = vadd.xlane.f32.xlu1 %v3806_v59 }
 0xeef   : > { %v3804_v60 = vpop.xlane.xlu0 %3803 }
 0xef0   : > { %v3805_v61 = vmul.f32 0.0078125, %v3804_v60 }
 0xef1   : > { %v3808_v62 = vpop.xlane.xlu1 %3807 }
 0xef2   : > { %v3810_v63 = vmul.f32 %v3805_v61, %v3805_v61  ;;  %v3809_v0 = vmul.f32 0.0078125, %v3808_v62  ;;  %v3812_v5 = vsub.f32 %v3800_v57, %v3805_v61 }
 0xef4   : > { %v3811_v1 = vsub.f32 %v3809_v0, %v3810_v63 }
 0xef6   : > { %v3813_v3 = vadd.f32 1e-05, %v3811_v1 }
 0xef8   : > { %4777 = vrsqrt.f32 %v3813_v3 }
 0xf02   : > { %v4778_v4 = vpop.eup %4777 }
 0xf03   : > { %v3815_v7 = vmul.f32 %v4778_v4, %v3812_v5 }
 0xf05   : > { %v3822_v8 = vmul.f32 %v4043_v6, %v3815_v7 }
 0xf07   : > { %v3829_v9 = vadd.f32 %v4044_v15, %v3822_v8 }
 0xf09   : > { %v3830_v10 = vmax.f32 %v3829_v9, 0.0 }
 0xf0b   : > { %v3831_v11 = vadd.f32 %v3830_v10, %v3829_v9 }
 0xf0d   : > { %3834 = vadd.xlane.f32.xlu0 %v3831_v11  ;;  %v3837_v12 = vmul.f32 %v3831_v11, %v3831_v11 }
 0xf0f   : > { %3838 = vadd.xlane.f32.xlu1 %v3837_v12 }
 0xf9a   : > { %v3835_v13 = vpop.xlane.xlu0 %3834 }
 0xf9b   : > { %v3836_v14 = vmul.f32 0.0078125, %v3835_v13 }
 0xf9c   : > { %v3839_v17 = vpop.xlane.xlu1 %3838 }
 0xf9d   : > { %v3841_v27 = vmul.f32 %v3836_v14, %v3836_v14  ;;  %v3840_v21 = vmul.f32 0.0078125, %v3839_v17  ;;  %v3843_v16 = vsub.f32 %v3831_v11, %v3836_v14 }
 0xf9f   : > { %v3842_v19 = vsub.f32 %v3840_v21, %v3841_v27 }
 0xfa1   : > { %v3844_v24 = vadd.f32 1e-05, %v3842_v19 }
 0xfa3   : > { %4779 = vrsqrt.f32 %v3844_v24 }
 0xfad   : > { %v4780_v22 = vpop.eup %4779 }
 0xfae   : > { %v3846_v25 = vmul.f32 %v4780_v22, %v3843_v16 }
 0xfb0   : > { %v3853_v26 = vmul.f32 %v4045_v23, %v3846_v25 }
 0xfb2   : > { %v3860_v31 = vadd.f32 %v4046_v18, %v3853_v26 }
 0xfb4   : > { %3861 = vst [vmem:[%s539_s30] sm:$0xff] %v3860_v31 }
 0xfb5   : > { %4795 = shalt.err (!%p4792_p3)
}
 0xfb6   : > { %s4796_s26 = scalar_lea.hbm %s5526_s2, 128  ;;  %s4800_s20 = scalar_lea.hbm %s5611_s29, 256 }
 0xfb7   : > { %p4797_p4 = scmp.ne.s32.totalorder %s5526_s2, %s4796_s26  ;;  %p4801_p9 = scmp.lt.u32.totalorder %s5526_s2, %s5611_s29 }
 0xfb8   : > { %p4802_p10 = scmp.lt.u32.totalorder %s4800_s20, %s4796_s26  ;;  %p4804_p12 = scmp.lt.u32.totalorder %s4796_s26, %s5526_s2 }
 0xfb9   : > { %p4798_p7 = pnand %p4797_p4, %p4978_p5 }
 0xfba   : > { %p4803_p11 = por %p4802_p10, %p4801_p9 }
 0xfbb   : > { %p4799_p8 = pneg %p4798_p7 }
 0xfbc   : > { %p4805_p13 = por %p4804_p12, %p4803_p11 }
 0xfbe   : > { %p4806_p0 = pnand %p4805_p13, %p4799_p8 }
 0xfc0   : > { %4809 = shalt.err (!%p4806_p0)
}
 0xfc1   : > { %4423 = dma.vmem_to_hbm [thread:$0]  (%p4978_p5), %s5528_s19, 128, %s5526_s2, %s3863_s0  }
 0xfc2 PF: > { %s5612_s27 = sld [smem:[#allocation7_spill]]  ;;  %s5613_s17 = sld [smem:[#allocation5_spill]] }
 0xfc8   : > { %p4429_p1 = scmp.ge.s32.totalorder %s5612_s27, 2  ;;  %s3888_s18 = sand.u32 1, %s5613_s17  }
 0xfc9   : > { %s3889_s21 = scalar_lea.sflag [#allocation3], %s3888_s18 }
 0xfca   : > { %p4426_p2 = pnand %p4429_p1, %p4982_p6 }
 0xfcc   : > { %4827 = dma.done.wait (!%p4426_p2), %s3889_s21, 128  }
 0xfcd   : > { %4829 = vsyncadd (!%p4426_p2), %s3889_s21, 4294967168  ;;  %s5615_s27 = sld [smem:[#allocation8_spill]]  ;;  %s5616_s26 = sld [smem:[#allocation6_spill]] }
 0xfce   : > { %s5617_s22 = sld [smem:[#allocation9_spill]]  ;;  %s5618_s24 = smov %s4836_s25 }
 0xfd3   : > { %p27_p3 = scmp.ge.s32.totalorder %s5615_s27, 4   ;;  %s5619_s25 = smov %s5616_s26 }
 0xfd4   : > { %s5620_s26 = smov %s5617_s22 }
 0xfd5   :  { %29 = sbr.rel (!%p27_p3) target bundleno = 9 (0x9), region = 123 }
 0xfdc   :  { %3894 = vsyncpa [#allocation3], 1 }
 0xfdd   :  { %3896 = vsyncpa [#allocation3 + $0x1], 1 }

</bundles_post_ra>
